<compile_context>
chip_gen: v5e
topology: v5e:2x2
jax: 0.10.0
libtpu: 0.0.40
codegen_flags: <defaults>
</compile_context>

<pallas_src>
import jax
import jax.numpy as jnp
from jax.experimental import pallas as pl
from jax.experimental.pallas import tpu as pltpu
from functools import partial


def _round_up(n, m):
    return ((n + m - 1) // m) * m


def _bottleneck_kernel(x_ref, w1_ref, b1_ref, w2_ref, b2_ref, m1_ref,
                       o_ref, h1_ref, *, K, Wp, NW, lead, add):
    """Fused Bottleneck forward for one batch element.

    x_ref  : (1, C1P, LB)        bf16  `lead` zeros, flattened padded image, zero tail.
    w*_ref : (K*K, CoutP, CinP)  bf16  per-tap weight matrices (BN scale folded in).
    b*_ref : (CoutP, 1)          f32   folded BN bias.
    m1_ref : (1, NW)             f32   1.0 at real-pixel lanes of the cv1 output, else 0.
    o_ref  : (1, C2P, NW)        f32   "wide" cv2 (+residual) output; wrapper extracts pixels.
    h1_ref : (CmP, LB)           f32   VMEM scratch: padded cv1 activation between phases.

    A 3x3 'same' conv in this layout is 9 shifted matmuls: for tap (kh, kw) the RHS is the
    contiguous lane window of the flattened buffer starting at kh*Wp + kw, so every MXU
    operand is lane-dense and no relayout copies are generated.
    """
    def conv_phase(window, w_ref, b_ref):
        cout = w_ref.shape[1]
        # At (8, NW) f32 the accumulator fits in a few vregs; move to a VMEM scratch
        # accumulator (pl.when init/finalize) only when tiles grow to 128/256-wide C2.
        acc = jnp.zeros((cout, NW), jnp.float32)
        for kh in range(K):
            for kw in range(K):
                acc = acc + jnp.dot(w_ref[kh * K + kw], window(kh * Wp + kw),
                                    preferred_element_type=jnp.float32)
        y = acc + b_ref[...]             # folded-BN bias, f32
        return y * jax.nn.sigmoid(y)     # SiLU in f32 (EUP)

    # ---- cv1: Conv3x3 + BN + SiLU ----------------------------------------------------
    h1 = conv_phase(lambda s: x_ref[0, :, pl.ds(s, NW)], w1_ref, b1_ref)
    h1 = h1 * m1_ref[...]                # zero every lane that is not a real pixel
    # Keep the padded cv1 activation in VMEM (no HBM round trip); aligned stores only.
    h1_ref[...] = jnp.zeros(h1_ref.shape, h1_ref.dtype)
    h1_ref[:, pl.ds(0, NW)] = h1         # aligned prefix store (NW is a multiple of 128)

    # ---- cv2: Conv3x3 + BN + SiLU ----------------------------------------------------
    y = conv_phase(lambda s: h1_ref[:, pl.ds(s, NW)].astype(jnp.bfloat16),
                   w2_ref, b2_ref)

    # ---- optional residual (shortcut and c1 == c2): x in the same wide layout ---------
    if add:
        y = y + x_ref[0, :, pl.ds(2 * lead, NW)].astype(jnp.float32)

    o_ref[0] = y.astype(o_ref.dtype)


def _fold_bn(w_oihw, gamma, beta, mean, var, cop, cip, eps):
    """Fold eval-mode BatchNorm into the conv.  Returns per-tap (K*K, CoutP, CinP) bf16
    weight matrices (scale folded in) and the (CoutP, 1) f32 bias."""
    co, ci, k, _ = w_oihw.shape
    inv = gamma.astype(jnp.float32) / jnp.sqrt(var.astype(jnp.float32) + eps)
    w = w_oihw.astype(jnp.float32) * inv[:, None, None, None]
    b = beta.astype(jnp.float32) - mean.astype(jnp.float32) * inv
    w = jnp.transpose(w, (2, 3, 0, 1)).reshape(k * k, co, ci)       # (K*K, O, I)
    w = jnp.pad(w, ((0, 0), (0, cop - co), (0, cip - ci)))
    b = jnp.pad(b, (0, cop - co)).reshape(cop, 1)
    return w.astype(jnp.bfloat16), b


def bottleneck(x, w1, g1, be1, mu1, va1, w2, g2, be2, mu2, va2,
               *, shortcut=True, eps=1e-5):
    """Pallas TPU forward of the PyTorch `Bottleneck` (eval-mode BN folded).

    x : (B, C1, H, W);  w1 : (Cm, C1, K, K) + BN1 params (Cm,);  w2 : (C2, Cm, K, K) + BN2.
    Returns (B, C2, H, W) = x + cv2(cv1(x)) if shortcut and C1 == C2 else cv2(cv1(x)).
    """
    B, C1, H, W = x.shape
    Cm, c1w, K, k2 = w1.shape
    C2, cmw, kb, _ = w2.shape
    assert c1w == C1 and cmw == Cm and K == k2 == kb and K % 2 == 1
    # TODO(synk): groups>1, stride>1 and dilation>1 Conv variants are not implemented
    # (this Bottleneck config uses g=1, s=1, d=1, k=(3,3)); BN is eval-mode (folded).
    add = bool(shortcut and (C1 == C2))

    pad = K // 2                               # autopad(k, None, 1) -> 'same'
    Hp, Wp = H + 2 * pad, W + 2 * pad
    lead = pad * (Wp + 1)                      # offset of pixel (0,0) in the padded buffer
    NW = _round_up(H * Wp + lead, 128)         # lane-dense "wide" width (multiple of 128)
    LB = max(NW + 2 * lead, lead + Hp * Wp)    # buffer length covering every shifted window

    C1P = _round_up(C1, 8)                     # channel axes live on sublanes -> pad to 8
    CmP = _round_up(Cm, 8)
    C2P = _round_up(C2, 8)

    # ---- glue (plain JAX): layout, spatial padding, BN folding, bf16 casts ------------
    xf = x.astype(jnp.float32)
    x_pad = jnp.pad(xf, ((0, 0), (0, C1P - C1), (pad, pad), (pad, pad)))   # (B,C1P,Hp,Wp)
    x_buf = jnp.pad(x_pad.reshape(B, C1P, Hp * Wp),
                    ((0, 0), (0, 0), (lead, LB - lead - Hp * Wp)))
    x_buf = x_buf.astype(jnp.bfloat16)                                      # bf16 operands

    w1p, b1p = _fold_bn(w1, g1, be1, mu1, va1, CmP, C1P, eps)
    w2p, b2p = _fold_bn(w2, g2, be2, mu2, va2, C2P, CmP, eps)

    j = jnp.arange(NW, dtype=jnp.int32)        # mask of real-pixel lanes of a conv output
    m1 = (j >= lead) & (j < lead + H * Wp) & (((j - lead) % Wp) < W)
    m1 = m1.astype(jnp.float32)[None, :]                                    # (1, NW)

    kernel = partial(_bottleneck_kernel, K=K, Wp=Wp, NW=NW, lead=lead, add=add)

    out_wide = pl.pallas_call(
        kernel,
        out_shape=jax.ShapeDtypeStruct((B, C2P, NW), jnp.float32),
        grid_spec=pltpu.PrefetchScalarGridSpec(
            num_scalar_prefetch=0,
            grid=(B,),                          # B=2 -> 2 parallel steps (v7x has 2 TCs)
            in_specs=[
                pl.BlockSpec((1, C1P, LB), lambda b: (b, 0, 0)),
                pl.BlockSpec((K * K, CmP, C1P), lambda b: (0, 0, 0)),
                pl.BlockSpec((CmP, 1), lambda b: (0, 0)),
                pl.BlockSpec((K * K, C2P, CmP), lambda b: (0, 0, 0)),
                pl.BlockSpec((C2P, 1), lambda b: (0, 0)),
                pl.BlockSpec((1, NW), lambda b: (0, 0)),
            ],
            out_specs=pl.BlockSpec((1, C2P, NW), lambda b: (b, 0, 0)),
            scratch_shapes=[pltpu.VMEM((CmP, LB), jnp.float32)],
        ),
        compiler_params=pltpu.CompilerParams(
            dimension_semantics=("parallel",)),
    )(x_buf, w1p, b1p, w2p, b2p, m1)

    # Wide -> NCHW: drop channel padding, keep only real-pixel lanes (cheap XLA slice).
    out = out_wide[:, :C2, :H * Wp].reshape(B, C2, H, Wp)[:, :, :, :W]
    return out.astype(x.dtype)


# ------------------------------ pure-JAX references -------------------------------------
def _ref_conv_bn_silu(x, w, gamma, beta, mean, var, eps=1e-5, bf16_operands=False):
    inv = gamma / jnp.sqrt(var + eps)
    wf = w * inv[:, None, None, None]
    bias = beta - mean * inv
    if bf16_operands:
        x = x.astype(jnp.bfloat16).astype(jnp.float32)
        wf = wf.astype(jnp.bfloat16).astype(jnp.float32)
    y = jax.lax.conv_general_dilated(
        x, wf, window_strides=(1, 1), padding="SAME",
        dimension_numbers=("NCHW", "OIHW", "NCHW"),
        precision=jax.lax.Precision.HIGHEST)
    y = y + bias[None, :, None, None]
    return y * jax.nn.sigmoid(y)


if __name__ == "__main__":
    # Bottleneck(c1=8, c2=8, shortcut=True, g=1, k=(3, 3), e=0.5) -> hidden c_ = 4
    B, C1, C2, H, W, K = 2, 8, 8, 16, 16, 3
    Cm = int(C2 * 0.5)

    key = jax.random.PRNGKey(0)
    ks = jax.random.split(key, 11)
    x   = jax.random.normal(ks[0], (B, C1, H, W), dtype=jnp.float32)
    w1  = jax.random.normal(ks[1], (Cm, C1, K, K), dtype=jnp.float32) * 0.1
    g1  = 1.0 + 0.1 * jax.random.normal(ks[2], (Cm,), dtype=jnp.float32)
    be1 = 0.1 * jax.random.normal(ks[3], (Cm,), dtype=jnp.float32)
    mu1 = 0.1 * jax.random.normal(ks[4], (Cm,), dtype=jnp.float32)
    va1 = jnp.abs(1.0 + 0.1 * jax.random.normal(ks[5], (Cm,), dtype=jnp.float32))
    w2  = jax.random.normal(ks[6], (C2, Cm, K, K), dtype=jnp.float32) * 0.1
    g2  = 1.0 + 0.1 * jax.random.normal(ks[7], (C2,), dtype=jnp.float32)
    be2 = 0.1 * jax.random.normal(ks[8], (C2,), dtype=jnp.float32)
    mu2 = 0.1 * jax.random.normal(ks[9], (C2,), dtype=jnp.float32)
    va2 = jnp.abs(1.0 + 0.1 * jax.random.normal(ks[10], (C2,), dtype=jnp.float32))

    out = bottleneck(x, w1, g1, be1, mu1, va1, w2, g2, be2, mu2, va2, shortcut=True)
    out = jax.block_until_ready(out)
    assert out.shape == (B, C2, H, W)

    # Reference 1: identical math with bf16 conv operands (matches the kernel's precision).
    h1b = _ref_conv_bn_silu(x, w1, g1, be1, mu1, va1, bf16_operands=True)
    y2b = _ref_conv_bn_silu(h1b, w2, g2, be2, mu2, va2, bf16_operands=True)
    ref_bf16 = x.astype(jnp.bfloat16).astype(jnp.float32) + y2b
    assert jnp.allclose(out, ref_bf16, atol=1e-2, rtol=1e-2), \
        f"mismatch vs precision-matched reference: {jnp.max(jnp.abs(out - ref_bf16))}"

    # Reference 2: pure-f32 eval-mode module semantics (loose bound on bf16 effects).
    h1f = _ref_conv_bn_silu(x, w1, g1, be1, mu1, va1)
    ref_f32 = x + _ref_conv_bn_silu(h1f, w2, g2, be2, mu2, va2)
    assert jnp.allclose(out, ref_f32, atol=1e-1, rtol=1e-1), \
        f"mismatch vs f32 reference: {jnp.max(jnp.abs(out - ref_f32))}"

    print("KERNEL_OK")
</pallas_src>

<mosaic_0001>
module attributes {stable_mosaic.version = 11 : i64} {
  func.func @_bottleneck_kernel(%arg0: i32, %arg1: memref<1x8x422xbf16, #tpu.memory_space<vmem>>, %arg2: memref<9x8x8xbf16, #tpu.memory_space<vmem>>, %arg3: memref<8x1xf32, #tpu.memory_space<vmem>>, %arg4: memref<9x8x8xbf16, #tpu.memory_space<vmem>>, %arg5: memref<8x1xf32, #tpu.memory_space<vmem>>, %arg6: memref<1x384xf32, #tpu.memory_space<vmem>>, %arg7: memref<1x8x384xf32, #tpu.memory_space<vmem>>, %arg8: memref<8x422xf32, #tpu.memory_space<vmem>>) attributes {dimension_semantics = [#tpu.dimension_semantics<parallel>], iteration_bounds = array<i64: 2>, scalar_prefetch = 0 : i64, scratch_operands = 1 : i64, tpu.core_type = #tpu.core_type<tc>, window_params = [{transform_indices = @transform_0, window_bounds = array<i64: 1, 8, 422>}, {pipeline_mode = #tpu.pipeline_mode<synchronous>, transform_indices = @transform_1, window_bounds = array<i64: 9, 8, 8>}, {pipeline_mode = #tpu.pipeline_mode<synchronous>, transform_indices = @transform_2, window_bounds = array<i64: 8, 1>}, {pipeline_mode = #tpu.pipeline_mode<synchronous>, transform_indices = @transform_3, window_bounds = array<i64: 9, 8, 8>}, {pipeline_mode = #tpu.pipeline_mode<synchronous>, transform_indices = @transform_4, window_bounds = array<i64: 8, 1>}, {pipeline_mode = #tpu.pipeline_mode<synchronous>, transform_indices = @transform_5, window_bounds = array<i64: 1, 384>}, {transform_indices = @transform_6, window_bounds = array<i64: 1, 8, 384>}]} {
    %cst = arith.constant 0.000000e+00 : f32
    %0 = vector.broadcast %cst : f32 to vector<8x384xf32>
    %c0 = arith.constant 0 : index
    %c0_0 = arith.constant 0 : index
    %c0_1 = arith.constant 0 : index
    %1 = vector.load %arg2[%c0, %c0_0, %c0_1] : memref<9x8x8xbf16, #tpu.memory_space<vmem>>, vector<1x8x8xbf16>
    %2 = vector.shape_cast %1 : vector<1x8x8xbf16> to vector<8x8xbf16>
    %c0_2 = arith.constant 0 : index
    %c0_3 = arith.constant 0 : index
    %c0_4 = arith.constant 0 : index
    %3 = vector.load %arg1[%c0_2, %c0_3, %c0_4] : memref<1x8x422xbf16, #tpu.memory_space<vmem>>, vector<1x8x384xbf16>
    %4 = vector.shape_cast %3 : vector<1x8x384xbf16> to vector<8x384xbf16>
    %cst_5 = arith.constant dense<0.000000e+00> : vector<8x384xf32>
    %5 = tpu.matmul %2, %4, %cst_5 {dimension_numbers = #tpu.dot_dimension_numbers<[1], [0], [0], [1], [0, 0, 1, 1], [], []>} : vector<8x8xbf16>, vector<8x384xbf16>, vector<8x384xf32> -> vector<8x384xf32>
    %6 = arith.addf %0, %5 : vector<8x384xf32>
    %c1 = arith.constant 1 : index
    %c0_6 = arith.constant 0 : index
    %c0_7 = arith.constant 0 : index
    %7 = vector.load %arg2[%c1, %c0_6, %c0_7] : memref<9x8x8xbf16, #tpu.memory_space<vmem>>, vector<1x8x8xbf16>
    %8 = vector.shape_cast %7 : vector<1x8x8xbf16> to vector<8x8xbf16>
    %c0_8 = arith.constant 0 : index
    %c0_9 = arith.constant 0 : index
    %c1_10 = arith.constant 1 : index
    %9 = vector.load %arg1[%c0_8, %c0_9, %c1_10] : memref<1x8x422xbf16, #tpu.memory_space<vmem>>, vector<1x8x384xbf16>
    %10 = vector.shape_cast %9 : vector<1x8x384xbf16> to vector<8x384xbf16>
    %cst_11 = arith.constant dense<0.000000e+00> : vector<8x384xf32>
    %11 = tpu.matmul %8, %10, %cst_11 {dimension_numbers = #tpu.dot_dimension_numbers<[1], [0], [0], [1], [0, 0, 1, 1], [], []>} : vector<8x8xbf16>, vector<8x384xbf16>, vector<8x384xf32> -> vector<8x384xf32>
    %12 = arith.addf %6, %11 : vector<8x384xf32>
    %c2 = arith.constant 2 : index
    %c0_12 = arith.constant 0 : index
    %c0_13 = arith.constant 0 : index
    %13 = vector.load %arg2[%c2, %c0_12, %c0_13] : memref<9x8x8xbf16, #tpu.memory_space<vmem>>, vector<1x8x8xbf16>
    %14 = vector.shape_cast %13 : vector<1x8x8xbf16> to vector<8x8xbf16>
    %c0_14 = arith.constant 0 : index
    %c0_15 = arith.constant 0 : index
    %c2_16 = arith.constant 2 : index
    %15 = vector.load %arg1[%c0_14, %c0_15, %c2_16] : memref<1x8x422xbf16, #tpu.memory_space<vmem>>, vector<1x8x384xbf16>
    %16 = vector.shape_cast %15 : vector<1x8x384xbf16> to vector<8x384xbf16>
    %cst_17 = arith.constant dense<0.000000e+00> : vector<8x384xf32>
    %17 = tpu.matmul %14, %16, %cst_17 {dimension_numbers = #tpu.dot_dimension_numbers<[1], [0], [0], [1], [0, 0, 1, 1], [], []>} : vector<8x8xbf16>, vector<8x384xbf16>, vector<8x384xf32> -> vector<8x384xf32>
    %18 = arith.addf %12, %17 : vector<8x384xf32>
    %c3 = arith.constant 3 : index
    %c0_18 = arith.constant 0 : index
    %c0_19 = arith.constant 0 : index
    %19 = vector.load %arg2[%c3, %c0_18, %c0_19] : memref<9x8x8xbf16, #tpu.memory_space<vmem>>, vector<1x8x8xbf16>
    %20 = vector.shape_cast %19 : vector<1x8x8xbf16> to vector<8x8xbf16>
    %c0_20 = arith.constant 0 : index
    %c0_21 = arith.constant 0 : index
    %c18 = arith.constant 18 : index
    %21 = vector.load %arg1[%c0_20, %c0_21, %c18] : memref<1x8x422xbf16, #tpu.memory_space<vmem>>, vector<1x8x384xbf16>
    %22 = vector.shape_cast %21 : vector<1x8x384xbf16> to vector<8x384xbf16>
    %cst_22 = arith.constant dense<0.000000e+00> : vector<8x384xf32>
    %23 = tpu.matmul %20, %22, %cst_22 {dimension_numbers = #tpu.dot_dimension_numbers<[1], [0], [0], [1], [0, 0, 1, 1], [], []>} : vector<8x8xbf16>, vector<8x384xbf16>, vector<8x384xf32> -> vector<8x384xf32>
    %24 = arith.addf %18, %23 : vector<8x384xf32>
    %c4 = arith.constant 4 : index
    %c0_23 = arith.constant 0 : index
    %c0_24 = arith.constant 0 : index
    %25 = vector.load %arg2[%c4, %c0_23, %c0_24] : memref<9x8x8xbf16, #tpu.memory_space<vmem>>, vector<1x8x8xbf16>
    %26 = vector.shape_cast %25 : vector<1x8x8xbf16> to vector<8x8xbf16>
    %c0_25 = arith.constant 0 : index
    %c0_26 = arith.constant 0 : index
    %c19 = arith.constant 19 : index
    %27 = vector.load %arg1[%c0_25, %c0_26, %c19] : memref<1x8x422xbf16, #tpu.memory_space<vmem>>, vector<1x8x384xbf16>
    %28 = vector.shape_cast %27 : vector<1x8x384xbf16> to vector<8x384xbf16>
    %cst_27 = arith.constant dense<0.000000e+00> : vector<8x384xf32>
    %29 = tpu.matmul %26, %28, %cst_27 {dimension_numbers = #tpu.dot_dimension_numbers<[1], [0], [0], [1], [0, 0, 1, 1], [], []>} : vector<8x8xbf16>, vector<8x384xbf16>, vector<8x384xf32> -> vector<8x384xf32>
    %30 = arith.addf %24, %29 : vector<8x384xf32>
    %c5 = arith.constant 5 : index
    %c0_28 = arith.constant 0 : index
    %c0_29 = arith.constant 0 : index
    %31 = vector.load %arg2[%c5, %c0_28, %c0_29] : memref<9x8x8xbf16, #tpu.memory_space<vmem>>, vector<1x8x8xbf16>
    %32 = vector.shape_cast %31 : vector<1x8x8xbf16> to vector<8x8xbf16>
    %c0_30 = arith.constant 0 : index
    %c0_31 = arith.constant 0 : index
    %c20 = arith.constant 20 : index
    %33 = vector.load %arg1[%c0_30, %c0_31, %c20] : memref<1x8x422xbf16, #tpu.memory_space<vmem>>, vector<1x8x384xbf16>
    %34 = vector.shape_cast %33 : vector<1x8x384xbf16> to vector<8x384xbf16>
    %cst_32 = arith.constant dense<0.000000e+00> : vector<8x384xf32>
    %35 = tpu.matmul %32, %34, %cst_32 {dimension_numbers = #tpu.dot_dimension_numbers<[1], [0], [0], [1], [0, 0, 1, 1], [], []>} : vector<8x8xbf16>, vector<8x384xbf16>, vector<8x384xf32> -> vector<8x384xf32>
    %36 = arith.addf %30, %35 : vector<8x384xf32>
    %c6 = arith.constant 6 : index
    %c0_33 = arith.constant 0 : index
    %c0_34 = arith.constant 0 : index
    %37 = vector.load %arg2[%c6, %c0_33, %c0_34] : memref<9x8x8xbf16, #tpu.memory_space<vmem>>, vector<1x8x8xbf16>
    %38 = vector.shape_cast %37 : vector<1x8x8xbf16> to vector<8x8xbf16>
    %c0_35 = arith.constant 0 : index
    %c0_36 = arith.constant 0 : index
    %c36 = arith.constant 36 : index
    %39 = vector.load %arg1[%c0_35, %c0_36, %c36] : memref<1x8x422xbf16, #tpu.memory_space<vmem>>, vector<1x8x384xbf16>
    %40 = vector.shape_cast %39 : vector<1x8x384xbf16> to vector<8x384xbf16>
    %cst_37 = arith.constant dense<0.000000e+00> : vector<8x384xf32>
    %41 = tpu.matmul %38, %40, %cst_37 {dimension_numbers = #tpu.dot_dimension_numbers<[1], [0], [0], [1], [0, 0, 1, 1], [], []>} : vector<8x8xbf16>, vector<8x384xbf16>, vector<8x384xf32> -> vector<8x384xf32>
    %42 = arith.addf %36, %41 : vector<8x384xf32>
    %c7 = arith.constant 7 : index
    %c0_38 = arith.constant 0 : index
    %c0_39 = arith.constant 0 : index
    %43 = vector.load %arg2[%c7, %c0_38, %c0_39] : memref<9x8x8xbf16, #tpu.memory_space<vmem>>, vector<1x8x8xbf16>
    %44 = vector.shape_cast %43 : vector<1x8x8xbf16> to vector<8x8xbf16>
    %c0_40 = arith.constant 0 : index
    %c0_41 = arith.constant 0 : index
    %c37 = arith.constant 37 : index
    %45 = vector.load %arg1[%c0_40, %c0_41, %c37] : memref<1x8x422xbf16, #tpu.memory_space<vmem>>, vector<1x8x384xbf16>
    %46 = vector.shape_cast %45 : vector<1x8x384xbf16> to vector<8x384xbf16>
    %cst_42 = arith.constant dense<0.000000e+00> : vector<8x384xf32>
    %47 = tpu.matmul %44, %46, %cst_42 {dimension_numbers = #tpu.dot_dimension_numbers<[1], [0], [0], [1], [0, 0, 1, 1], [], []>} : vector<8x8xbf16>, vector<8x384xbf16>, vector<8x384xf32> -> vector<8x384xf32>
    %48 = arith.addf %42, %47 : vector<8x384xf32>
    %c8 = arith.constant 8 : index
    %c0_43 = arith.constant 0 : index
    %c0_44 = arith.constant 0 : index
    %49 = vector.load %arg2[%c8, %c0_43, %c0_44] : memref<9x8x8xbf16, #tpu.memory_space<vmem>>, vector<1x8x8xbf16>
    %50 = vector.shape_cast %49 : vector<1x8x8xbf16> to vector<8x8xbf16>
    %c0_45 = arith.constant 0 : index
    %c0_46 = arith.constant 0 : index
    %c38 = arith.constant 38 : index
    %51 = vector.load %arg1[%c0_45, %c0_46, %c38] : memref<1x8x422xbf16, #tpu.memory_space<vmem>>, vector<1x8x384xbf16>
    %52 = vector.shape_cast %51 : vector<1x8x384xbf16> to vector<8x384xbf16>
    %cst_47 = arith.constant dense<0.000000e+00> : vector<8x384xf32>
    %53 = tpu.matmul %50, %52, %cst_47 {dimension_numbers = #tpu.dot_dimension_numbers<[1], [0], [0], [1], [0, 0, 1, 1], [], []>} : vector<8x8xbf16>, vector<8x384xbf16>, vector<8x384xf32> -> vector<8x384xf32>
    %54 = arith.addf %48, %53 : vector<8x384xf32>
    %c0_48 = arith.constant 0 : index
    %c0_49 = arith.constant 0 : index
    %55 = vector.load %arg3[%c0_48, %c0_49] : memref<8x1xf32, #tpu.memory_space<vmem>>, vector<8x1xf32>
    %56 = vector.broadcast %55 : vector<8x1xf32> to vector<8x384xf32>
    %57 = arith.addf %54, %56 : vector<8x384xf32>
    %58 = arith.negf %57 : vector<8x384xf32>
    %59 = math.exp %58 : vector<8x384xf32>
    %cst_50 = arith.constant 1.000000e+00 : f32
    %60 = vector.broadcast %cst_50 : f32 to vector<8x384xf32>
    %61 = arith.addf %60, %59 : vector<8x384xf32>
    %62 = arith.divf %60, %61 : vector<8x384xf32>
    %63 = arith.mulf %57, %62 : vector<8x384xf32>
    %c0_51 = arith.constant 0 : index
    %c0_52 = arith.constant 0 : index
    %64 = vector.load %arg6[%c0_51, %c0_52] : memref<1x384xf32, #tpu.memory_space<vmem>>, vector<1x384xf32>
    %65 = vector.broadcast %64 : vector<1x384xf32> to vector<8x384xf32>
    %66 = arith.mulf %63, %65 : vector<8x384xf32>
    %cst_53 = arith.constant 0.000000e+00 : f32
    %67 = vector.broadcast %cst_53 : f32 to vector<8x422xf32>
    %c0_54 = arith.constant 0 : index
    %c0_55 = arith.constant 0 : index
    %68 = vector.load %arg8[%c0_54, %c0_55] : memref<8x422xf32, #tpu.memory_space<vmem>>, vector<8x422xf32>
    tpu.vector_store %arg8[%c0_54, %c0_55], %67 {strides = array<i32>} : memref<8x422xf32, #tpu.memory_space<vmem>>, vector<8x422xf32>,
    %c0_56 = arith.constant 0 : index
    %c0_57 = arith.constant 0 : index
    %69 = vector.load %arg8[%c0_56, %c0_57] : memref<8x422xf32, #tpu.memory_space<vmem>>, vector<8x384xf32>
    tpu.vector_store %arg8[%c0_56, %c0_57], %66 {strides = array<i32>} : memref<8x422xf32, #tpu.memory_space<vmem>>, vector<8x384xf32>,
    %cst_58 = arith.constant 0.000000e+00 : f32
    %70 = vector.broadcast %cst_58 : f32 to vector<8x384xf32>
    %c0_59 = arith.constant 0 : index
    %c0_60 = arith.constant 0 : index
    %c0_61 = arith.constant 0 : index
    %71 = vector.load %arg4[%c0_59, %c0_60, %c0_61] : memref<9x8x8xbf16, #tpu.memory_space<vmem>>, vector<1x8x8xbf16>
    %72 = vector.shape_cast %71 : vector<1x8x8xbf16> to vector<8x8xbf16>
    %c0_62 = arith.constant 0 : index
    %c0_63 = arith.constant 0 : index
    %73 = vector.load %arg8[%c0_62, %c0_63] : memref<8x422xf32, #tpu.memory_space<vmem>>, vector<8x384xf32>
    %74 = arith.truncf %73 : vector<8x384xf32> to vector<8x384xbf16>
    %cst_64 = arith.constant dense<0.000000e+00> : vector<8x384xf32>
    %75 = tpu.matmul %72, %74, %cst_64 {dimension_numbers = #tpu.dot_dimension_numbers<[1], [0], [0], [1], [0, 0, 1, 1], [], []>} : vector<8x8xbf16>, vector<8x384xbf16>, vector<8x384xf32> -> vector<8x384xf32>
    %76 = arith.addf %70, %75 : vector<8x384xf32>
    %c1_65 = arith.constant 1 : index
    %c0_66 = arith.constant 0 : index
    %c0_67 = arith.constant 0 : index
    %77 = vector.load %arg4[%c1_65, %c0_66, %c0_67] : memref<9x8x8xbf16, #tpu.memory_space<vmem>>, vector<1x8x8xbf16>
    %78 = vector.shape_cast %77 : vector<1x8x8xbf16> to vector<8x8xbf16>
    %c0_68 = arith.constant 0 : index
    %c1_69 = arith.constant 1 : index
    %79 = vector.load %arg8[%c0_68, %c1_69] : memref<8x422xf32, #tpu.memory_space<vmem>>, vector<8x384xf32>
    %80 = arith.truncf %79 : vector<8x384xf32> to vector<8x384xbf16>
    %cst_70 = arith.constant dense<0.000000e+00> : vector<8x384xf32>
    %81 = tpu.matmul %78, %80, %cst_70 {dimension_numbers = #tpu.dot_dimension_numbers<[1], [0], [0], [1], [0, 0, 1, 1], [], []>} : vector<8x8xbf16>, vector<8x384xbf16>, vector<8x384xf32> -> vector<8x384xf32>
    %82 = arith.addf %76, %81 : vector<8x384xf32>
    %c2_71 = arith.constant 2 : index
    %c0_72 = arith.constant 0 : index
    %c0_73 = arith.constant 0 : index
    %83 = vector.load %arg4[%c2_71, %c0_72, %c0_73] : memref<9x8x8xbf16, #tpu.memory_space<vmem>>, vector<1x8x8xbf16>
    %84 = vector.shape_cast %83 : vector<1x8x8xbf16> to vector<8x8xbf16>
    %c0_74 = arith.constant 0 : index
    %c2_75 = arith.constant 2 : index
    %85 = vector.load %arg8[%c0_74, %c2_75] : memref<8x422xf32, #tpu.memory_space<vmem>>, vector<8x384xf32>
    %86 = arith.truncf %85 : vector<8x384xf32> to vector<8x384xbf16>
    %cst_76 = arith.constant dense<0.000000e+00> : vector<8x384xf32>
    %87 = tpu.matmul %84, %86, %cst_76 {dimension_numbers = #tpu.dot_dimension_numbers<[1], [0], [0], [1], [0, 0, 1, 1], [], []>} : vector<8x8xbf16>, vector<8x384xbf16>, vector<8x384xf32> -> vector<8x384xf32>
    %88 = arith.addf %82, %87 : vector<8x384xf32>
    %c3_77 = arith.constant 3 : index
    %c0_78 = arith.constant 0 : index
    %c0_79 = arith.constant 0 : index
    %89 = vector.load %arg4[%c3_77, %c0_78, %c0_79] : memref<9x8x8xbf16, #tpu.memory_space<vmem>>, vector<1x8x8xbf16>
    %90 = vector.shape_cast %89 : vector<1x8x8xbf16> to vector<8x8xbf16>
    %c0_80 = arith.constant 0 : index
    %c18_81 = arith.constant 18 : index
    %91 = vector.load %arg8[%c0_80, %c18_81] : memref<8x422xf32, #tpu.memory_space<vmem>>, vector<8x384xf32>
    %92 = arith.truncf %91 : vector<8x384xf32> to vector<8x384xbf16>
    %cst_82 = arith.constant dense<0.000000e+00> : vector<8x384xf32>
    %93 = tpu.matmul %90, %92, %cst_82 {dimension_numbers = #tpu.dot_dimension_numbers<[1], [0], [0], [1], [0, 0, 1, 1], [], []>} : vector<8x8xbf16>, vector<8x384xbf16>, vector<8x384xf32> -> vector<8x384xf32>
    %94 = arith.addf %88, %93 : vector<8x384xf32>
    %c4_83 = arith.constant 4 : index
    %c0_84 = arith.constant 0 : index
    %c0_85 = arith.constant 0 : index
    %95 = vector.load %arg4[%c4_83, %c0_84, %c0_85] : memref<9x8x8xbf16, #tpu.memory_space<vmem>>, vector<1x8x8xbf16>
    %96 = vector.shape_cast %95 : vector<1x8x8xbf16> to vector<8x8xbf16>
    %c0_86 = arith.constant 0 : index
    %c19_87 = arith.constant 19 : index
    %97 = vector.load %arg8[%c0_86, %c19_87] : memref<8x422xf32, #tpu.memory_space<vmem>>, vector<8x384xf32>
    %98 = arith.truncf %97 : vector<8x384xf32> to vector<8x384xbf16>
    %cst_88 = arith.constant dense<0.000000e+00> : vector<8x384xf32>
    %99 = tpu.matmul %96, %98, %cst_88 {dimension_numbers = #tpu.dot_dimension_numbers<[1], [0], [0], [1], [0, 0, 1, 1], [], []>} : vector<8x8xbf16>, vector<8x384xbf16>, vector<8x384xf32> -> vector<8x384xf32>
    %100 = arith.addf %94, %99 : vector<8x384xf32>
    %c5_89 = arith.constant 5 : index
    %c0_90 = arith.constant 0 : index
    %c0_91 = arith.constant 0 : index
    %101 = vector.load %arg4[%c5_89, %c0_90, %c0_91] : memref<9x8x8xbf16, #tpu.memory_space<vmem>>, vector<1x8x8xbf16>
    %102 = vector.shape_cast %101 : vector<1x8x8xbf16> to vector<8x8xbf16>
    %c0_92 = arith.constant 0 : index
    %c20_93 = arith.constant 20 : index
    %103 = vector.load %arg8[%c0_92, %c20_93] : memref<8x422xf32, #tpu.memory_space<vmem>>, vector<8x384xf32>
    %104 = arith.truncf %103 : vector<8x384xf32> to vector<8x384xbf16>
    %cst_94 = arith.constant dense<0.000000e+00> : vector<8x384xf32>
    %105 = tpu.matmul %102, %104, %cst_94 {dimension_numbers = #tpu.dot_dimension_numbers<[1], [0], [0], [1], [0, 0, 1, 1], [], []>} : vector<8x8xbf16>, vector<8x384xbf16>, vector<8x384xf32> -> vector<8x384xf32>
    %106 = arith.addf %100, %105 : vector<8x384xf32>
    %c6_95 = arith.constant 6 : index
    %c0_96 = arith.constant 0 : index
    %c0_97 = arith.constant 0 : index
    %107 = vector.load %arg4[%c6_95, %c0_96, %c0_97] : memref<9x8x8xbf16, #tpu.memory_space<vmem>>, vector<1x8x8xbf16>
    %108 = vector.shape_cast %107 : vector<1x8x8xbf16> to vector<8x8xbf16>
    %c0_98 = arith.constant 0 : index
    %c36_99 = arith.constant 36 : index
    %109 = vector.load %arg8[%c0_98, %c36_99] : memref<8x422xf32, #tpu.memory_space<vmem>>, vector<8x384xf32>
    %110 = arith.truncf %109 : vector<8x384xf32> to vector<8x384xbf16>
    %cst_100 = arith.constant dense<0.000000e+00> : vector<8x384xf32>
    %111 = tpu.matmul %108, %110, %cst_100 {dimension_numbers = #tpu.dot_dimension_numbers<[1], [0], [0], [1], [0, 0, 1, 1], [], []>} : vector<8x8xbf16>, vector<8x384xbf16>, vector<8x384xf32> -> vector<8x384xf32>
    %112 = arith.addf %106, %111 : vector<8x384xf32>
    %c7_101 = arith.constant 7 : index
    %c0_102 = arith.constant 0 : index
    %c0_103 = arith.constant 0 : index
    %113 = vector.load %arg4[%c7_101, %c0_102, %c0_103] : memref<9x8x8xbf16, #tpu.memory_space<vmem>>, vector<1x8x8xbf16>
    %114 = vector.shape_cast %113 : vector<1x8x8xbf16> to vector<8x8xbf16>
    %c0_104 = arith.constant 0 : index
    %c37_105 = arith.constant 37 : index
    %115 = vector.load %arg8[%c0_104, %c37_105] : memref<8x422xf32, #tpu.memory_space<vmem>>, vector<8x384xf32>
    %116 = arith.truncf %115 : vector<8x384xf32> to vector<8x384xbf16>
    %cst_106 = arith.constant dense<0.000000e+00> : vector<8x384xf32>
    %117 = tpu.matmul %114, %116, %cst_106 {dimension_numbers = #tpu.dot_dimension_numbers<[1], [0], [0], [1], [0, 0, 1, 1], [], []>} : vector<8x8xbf16>, vector<8x384xbf16>, vector<8x384xf32> -> vector<8x384xf32>
    %118 = arith.addf %112, %117 : vector<8x384xf32>
    %c8_107 = arith.constant 8 : index
    %c0_108 = arith.constant 0 : index
    %c0_109 = arith.constant 0 : index
    %119 = vector.load %arg4[%c8_107, %c0_108, %c0_109] : memref<9x8x8xbf16, #tpu.memory_space<vmem>>, vector<1x8x8xbf16>
    %120 = vector.shape_cast %119 : vector<1x8x8xbf16> to vector<8x8xbf16>
    %c0_110 = arith.constant 0 : index
    %c38_111 = arith.constant 38 : index
    %121 = vector.load %arg8[%c0_110, %c38_111] : memref<8x422xf32, #tpu.memory_space<vmem>>, vector<8x384xf32>
    %122 = arith.truncf %121 : vector<8x384xf32> to vector<8x384xbf16>
    %cst_112 = arith.constant dense<0.000000e+00> : vector<8x384xf32>
    %123 = tpu.matmul %120, %122, %cst_112 {dimension_numbers = #tpu.dot_dimension_numbers<[1], [0], [0], [1], [0, 0, 1, 1], [], []>} : vector<8x8xbf16>, vector<8x384xbf16>, vector<8x384xf32> -> vector<8x384xf32>
    %124 = arith.addf %118, %123 : vector<8x384xf32>
    %c0_113 = arith.constant 0 : index
    %c0_114 = arith.constant 0 : index
    %125 = vector.load %arg5[%c0_113, %c0_114] : memref<8x1xf32, #tpu.memory_space<vmem>>, vector<8x1xf32>
    %126 = vector.broadcast %125 : vector<8x1xf32> to vector<8x384xf32>
    %127 = arith.addf %124, %126 : vector<8x384xf32>
    %128 = arith.negf %127 : vector<8x384xf32>
    %129 = math.exp %128 : vector<8x384xf32>
    %cst_115 = arith.constant 1.000000e+00 : f32
    %130 = vector.broadcast %cst_115 : f32 to vector<8x384xf32>
    %131 = arith.addf %130, %129 : vector<8x384xf32>
    %132 = arith.divf %130, %131 : vector<8x384xf32>
    %133 = arith.mulf %127, %132 : vector<8x384xf32>
    %c0_116 = arith.constant 0 : index
    %c0_117 = arith.constant 0 : index
    %c38_118 = arith.constant 38 : index
    %134 = vector.load %arg1[%c0_116, %c0_117, %c38_118] : memref<1x8x422xbf16, #tpu.memory_space<vmem>>, vector<1x8x384xbf16>
    %135 = vector.shape_cast %134 : vector<1x8x384xbf16> to vector<8x384xbf16>
    %136 = arith.extf %135 : vector<8x384xbf16> to vector<8x384xf32>
    %137 = arith.addf %133, %136 : vector<8x384xf32>
    %c0_119 = arith.constant 0 : index
    %c0_120 = arith.constant 0 : index
    %c0_121 = arith.constant 0 : index
    %138 = vector.load %arg7[%c0_119, %c0_120, %c0_121] : memref<1x8x384xf32, #tpu.memory_space<vmem>>, vector<1x8x384xf32>
    %139 = vector.shape_cast %138 : vector<1x8x384xf32> to vector<8x384xf32>
    %140 = vector.shape_cast %137 : vector<8x384xf32> to vector<1x8x384xf32>
    tpu.vector_store %arg7[%c0_119, %c0_120, %c0_121], %140 {strides = array<i32>} : memref<1x8x384xf32, #tpu.memory_space<vmem>>, vector<1x8x384xf32>,
    return
  }
  func.func @transform_0(%arg0: i32) -> (i32, i32, i32) {
    %c0_i32 = arith.constant 0 : i32
    %c0_i32_0 = arith.constant 0 : i32
    %c0_i32_1 = arith.constant 0 : i32
    return %arg0, %c0_i32, %c0_i32_0 : i32, i32, i32
  }
  func.func @transform_1(%arg0: i32) -> (i32, i32, i32) {
    %c0_i32 = arith.constant 0 : i32
    %c0_i32_0 = arith.constant 0 : i32
    %c0_i32_1 = arith.constant 0 : i32
    %c0_i32_2 = arith.constant 0 : i32
    return %c0_i32, %c0_i32_0, %c0_i32_1 : i32, i32, i32
  }
  func.func @transform_2(%arg0: i32) -> (i32, i32) {
    %c0_i32 = arith.constant 0 : i32
    %c0_i32_0 = arith.constant 0 : i32
    %c0_i32_1 = arith.constant 0 : i32
    return %c0_i32, %c0_i32_0 : i32, i32
  }
  func.func @transform_3(%arg0: i32) -> (i32, i32, i32) {
    %c0_i32 = arith.constant 0 : i32
    %c0_i32_0 = arith.constant 0 : i32
    %c0_i32_1 = arith.constant 0 : i32
    %c0_i32_2 = arith.constant 0 : i32
    return %c0_i32, %c0_i32_0, %c0_i32_1 : i32, i32, i32
  }
  func.func @transform_4(%arg0: i32) -> (i32, i32) {
    %c0_i32 = arith.constant 0 : i32
    %c0_i32_0 = arith.constant 0 : i32
    %c0_i32_1 = arith.constant 0 : i32
    return %c0_i32, %c0_i32_0 : i32, i32
  }
  func.func @transform_5(%arg0: i32) -> (i32, i32) {
    %c0_i32 = arith.constant 0 : i32
    %c0_i32_0 = arith.constant 0 : i32
    %c0_i32_1 = arith.constant 0 : i32
    return %c0_i32, %c0_i32_0 : i32, i32
  }
  func.func @transform_6(%arg0: i32) -> (i32, i32, i32) {
    %c0_i32 = arith.constant 0 : i32
    %c0_i32_0 = arith.constant 0 : i32
    %c0_i32_1 = arith.constant 0 : i32
    return %arg0, %c0_i32, %c0_i32_0 : i32, i32, i32
  }
}

</mosaic_0001>

<bundles_post_ra>
// kernel: tpu_custom_call.1
= control target key start
LH: loop header
LB: loop body
LE: loop exit
PB: predicated region body
PF: predicated region fallthrough
CT: control target
= control target key end

     0   :  { %11 = vsyncpa [#allocation4], 0  ;;  %s2404_s0 = inlined_call_operand.vmem [shape: bf16[2,8,422], index: 0, kind: input, shape index: {}]   ;;  %s2405_s1 = inlined_call_operand.vmem [shape: bf16[9,8,8], index: 1, kind: input, shape index: {}]   ;;  %s2406_s2 = inlined_call_operand.vmem [shape: f32[8,1], index: 2, kind: input, shape index: {}]   ;;  %s2407_s3 = inlined_call_operand.vmem [shape: bf16[9,8,8], index: 3, kind: input, shape index: {}]   ;;  %s2408_s4 = inlined_call_operand.vmem [shape: f32[8,1], index: 4, kind: input, shape index: {}]   ;;  %s2409_s5 = inlined_call_operand.vmem [shape: f32[1,384], index: 5, kind: input, shape index: {}]   ;;  %s2410_s6 = inlined_call_operand.hbm [shape: f32[2,8,384], index: 6, kind: output, shape index: {}]  }
   0x1   :  { %13 = vsyncpa [#allocation4 + $0x1], 0  ;;  %s2005_s21 = smov 0   ;;  %s2007_s22 = smov 0  }
   0x2   :  { %s2009_s23 = smov 0   ;;  %s2011_s24 = smov 0  }
   0x3 LB: > { %s2026_s25 = sadd.s32 4294967295, %s1958_s24   ;;  %s1723_s26 = sadd.s32 4294967294, %s1958_s24   ;;  %s1958_s24 = sphi %s2011_s24, %s2430_s24   ;;  %s1954_s23 = sphi %s2009_s23, %s2429_s23   ;;  %s1950_s22 = sphi %s2007_s22, %s2428_s22   ;;  %s1946_s21 = sphi %s2005_s21, %s2427_s21  }
   0x4   : > { %s2030_s27 = sadd.s32 1, %s1958_s24   ;;  %s157_s28 = sadd.s32 1, %s1954_s23 }
   0x5   : > { %s154_s29 = ssub.s32 %s1958_s24, %s2030_s27  ;;  %p167_p0 = scmp.ne.s32.totalorder %s1954_s23, %s1950_s22 }
   0x6   : > { %p155_p1 = scmp.eq.s32.totalorder %s154_s29, 0  ;;  %p168_p2 = scmp.eq.s32.totalorder %s2026_s25, 1 }
   0x7   : > { %p173_p3 = scmp.ne.s32.totalorder %s1950_s22, %s1946_s21  ;;  %p174_p4 = scmp.eq.s32.totalorder %s1723_s26, 1 }
   0x8   : > { %s2041_s30 = scalar_select %p155_p1, %s1954_s23, %s157_s28  }
   0x9   : > { %p2043_p5 = por %p168_p2, %p167_p0  ;;  %p2047_p6 = por %p174_p4, %p173_p3 }
   0xa   : > { %p1726_p7 = scmp.ge.s32.totalorder %s1958_s24, 1  ;;  %p215_p8 = scmp.lt.s32.totalorder %s1958_s24, 3 }
   0xc   : > { %p216_p9 = pnand %p1726_p7, %p215_p8 }
   0xd   : > { %p245_p10 = scmp.lt.s32.totalorder (!%p216_p9), %s2026_s25, 1  ;;  %s1960_s14 = smov (!%p216_p9), 127  }
   0xe   : > { %219 = sbr.rel (%p216_p9) target bundleno = 806 (0x326), region = 44  ;;  %s1961_s15 = smov (!%p216_p9), 126  }
   0xf   : > { %s1962_s16 = smov (!%p216_p9), 110   ;;  %s1963_s17 = smov (!%p216_p9), 109  }
  0x10   : > { %s1964_s18 = smov (!%p216_p9), 108   ;;  %s1965_s19 = smov (!%p216_p9), 92  }
  0x11   : > { %s1966_s20 = smov (!%p216_p9), 91   ;;  %s1967_s26 = smov (!%p216_p9), 90  }
  0x12   : > { %s1810_s11 = smul.u32 (!%p216_p9), 24, %s2026_s25 }
  0x13   : > { %s246_s9 = scalar_select %p245_p10, %s2026_s25, 1  ;;  %vm283_vm0 = vcmask 1043456   ;;  %v251_v11 = vld [vmem:[%s2405_s1] sm:$0xf]  ;;  %vm279_vm1 = vcmask 64512   ;;  %vm396_vm2 = vcmask 1031168  }
  0x14   : > { %vm275_vm3 = vcmask 1039360   ;;  %v1729_v32 = vld [vmem:[%s2405_s1 + $0x4] sm:$0xf]  ;;  %v1736_v40 = vld [vmem:[%s2405_s1 + $0x8] sm:$0xf]  ;;  %vm464_vm4 = vcmask 900096   ;;  %s1659_s25 = scalar_lea.hbm %s2410_s6, %s1810_s11 }
  0x15   : > { %s1808_s10 = sshll.u32 %s246_s9, 4  ;;  %vm532_vm5 = vcmask 891904   ;;  %v1740_v57 = vld [vmem:[%s2405_s1 + $0xc] sm:$0xf]  ;;  %vm600_vm6 = vcmask 883712   ;;  %vm2413_vm7 = vcmask 752640  }
  0x16   : > { %s2058_s13 = scalar_lea.vmem %s2404_s0, %s1808_s10  ;;  %vm2412_vm8 = vcmask 744448   ;;  %vm2411_vm9 = vcmask 736256   ;;  %vm945_vm10 = vcmask 310272   ;;  %s1663_s10 = sshll.u32 %s1659_s25, 4  ;;  %s1664_s10 = int_to_ptr.hbm [resolvable:$true] %s1663_s10 }
  0x17   : > { %v256_v0 = vld [vmem:[%s2058_s13 + $0x8] sm:$0xff]  ;;  %v252_v1 = vld [vmem:[%s2058_s13] sm:$0xff] }
  0x18   : > { %v261_v2 = vunpack.c.l.b16 %v256_v0  ;;  %v259_v3 = vunpack.c.l.b16 %v252_v1  ;;  %v262_v6 = vunpack.c.h.b16 %v256_v0  ;;  %v260_v7 = vunpack.c.h.b16 %v252_v1  ;;  %v253_v14 = vld [vmem:[%s2058_s13 + $0x8] sm:$0xf] }
  0x19   : > { %v333_v17 = vunpack.c.l.b16 %v253_v14 }
  0x1a   : > { %v265_v4 = vpack.c.b16 %v261_v2, %v261_v2  ;;  %v263_v5 = vpack.c.b16 %v259_v3, %v259_v3  ;;  %v266_v8 = vpack.c.b16 %v262_v6, %v262_v6  ;;  %v264_v9 = vpack.c.b16 %v260_v7, %v260_v7  ;;  %v1748_v7 = vld [vmem:[%s2405_s1 + $0x14] sm:$0xf] }
  0x1b   : > { %v334_v19 = vpack.c.b16 %v333_v17, %v333_v17 }
  0x1c   : > { %271 = vrot.lane.b32.xlu1 %v265_v4, %s1960_s14  ;;  %267 = vrot.lane.b32.xlu0 %v263_v5, %s1960_s14  ;;  %v339_v10 = vsel %vm283_vm0, %v263_v5, 0  ;;  %v342_v23 = vsel %vm283_vm0, %v264_v9, 0 }
  0x1d   : > { %388 = vrot.lane.b32.xlu2 %v263_v5, %s1961_s15  ;;  %354 = vmatpush.bf16.msra.mxu3 %v339_v10  ;;  %v345_v31 = vsel %vm283_vm0, %v334_v19, 0 }
  0x20   : > { %1733 = vmatmul.msk.bf16.vlgmr.msra.gmra.mxu3 %vm279_vm1, %v251_v11 }
  0x24   : > { %273 = vrot.lane.b32.xlu1 %v266_v8, %s1960_s14  ;;  %269 = vrot.lane.b32.xlu0 %v264_v9, %s1960_s14 }
  0x25   : > { %390 = vrot.lane.b32.xlu2 %v264_v9, %s1961_s15 }
  0x2c   : > { %392 = vrot.lane.b32.xlu0 %v265_v4, %s1961_s15  ;;  %394 = vrot.lane.b32.xlu1 %v266_v8, %s1961_s15 }
  0x2d   : > { %456 = vrot.lane.b32.xlu2 %v263_v5, %s1962_s16 }
  0x34   : > { %460 = vrot.lane.b32.xlu1 %v265_v4, %s1962_s16  ;;  %458 = vrot.lane.b32.xlu0 %v264_v9, %s1962_s16 }
  0x35   : > { %462 = vrot.lane.b32.xlu2 %v266_v8, %s1962_s16 }
  0x3c   : > { %526 = vrot.lane.b32.xlu1 %v264_v9, %s1963_s17  ;;  %524 = vrot.lane.b32.xlu0 %v263_v5, %s1963_s17 }
  0x3d   : > { %528 = vrot.lane.b32.xlu2 %v265_v4, %s1963_s17 }
  0x44   : > { %592 = vrot.lane.b32.xlu1 %v263_v5, %s1964_s18  ;;  %530 = vrot.lane.b32.xlu0 %v266_v8, %s1963_s17 }
  0x45   : > { %594 = vrot.lane.b32.xlu2 %v264_v9, %s1964_s18 }
  0x4c   : > { %598 = vrot.lane.b32.xlu1 %v266_v8, %s1964_s18  ;;  %596 = vrot.lane.b32.xlu0 %v265_v4, %s1964_s18 }
  0x4d   : > { %660 = vrot.lane.b32.xlu2 %v263_v5, %s1965_s19 }
  0x54   : > { %664 = vrot.lane.b32.xlu1 %v265_v4, %s1965_s19  ;;  %662 = vrot.lane.b32.xlu0 %v264_v9, %s1965_s19 }
  0x55   : > { %666 = vrot.lane.b32.xlu2 %v266_v8, %s1965_s19 }
  0x5c   : > { %728 = vrot.lane.b32.xlu0 %v263_v5, %s1966_s20  ;;  %730 = vrot.lane.b32.xlu1 %v264_v9, %s1966_s20 }
  0x5d   : > { %732 = vrot.lane.b32.xlu2 %v265_v4, %s1966_s20 }
  0x64   : > { %734 = vrot.lane.b32.xlu0 %v266_v8, %s1966_s20  ;;  %796 = vrot.lane.b32.xlu1 %v263_v5, %s1967_s26 }
  0x65   : > { %798 = vrot.lane.b32.xlu2 %v264_v9, %s1967_s26 }
  0x6c   : > { %802 = vrot.lane.b32.xlu1 %v266_v8, %s1967_s26  ;;  %800 = vrot.lane.b32.xlu0 %v265_v4, %s1967_s26 }
  0x77   : > { %v389_v12 = vpop.permute.xlu2 %388 }
  0x7f   : > { %v391_v13 = vpop.permute.xlu2 %390 }
  0x80   : > { %v397_v20 = vsel %vm396_vm2, %v389_v12, %v391_v13 }
  0x81   : > { %v404_v27 = vsel %vm283_vm0, %v397_v20, 0 }
  0x87   : > { %v457_v18 = vpop.permute.xlu2 %456 }
  0x8e   : > { %v272_v15 = vpop.permute.xlu1 %271  ;;  %v268_v16 = vpop.permute.xlu0 %267 }
  0x8f   : > { %v463_v33 = vpop.permute.xlu2 %462 }
  0x96   : > { %v274_v21 = vpop.permute.xlu1 %273  ;;  %v270_v22 = vpop.permute.xlu0 %269 }
  0x97   : > { %v276_v24 = vsel %vm275_vm3, %v268_v16, %v270_v22  ;;  %v277_v25 = vsel %vm275_vm3, %v270_v22, %v272_v15  ;;  %v278_v26 = vsel %vm275_vm3, %v272_v15, %v274_v21  ;;  %v529_v41 = vpop.permute.xlu2 %528  ;;  %v1744_v16 = vld [vmem:[%s2405_s1 + $0x10] sm:$0xf] }
  0x98   : > { %v285_v28 = vsel %vm283_vm0, %v276_v24, 0  ;;  %v288_v29 = vsel %vm283_vm0, %v277_v25, 0  ;;  %v291_v30 = vsel %vm283_vm0, %v278_v26, 0  ;;  %v1752_v25 = vld [vmem:[%s2405_s1 + $0x18] sm:$0xf] }
  0x99   : > { %300 = vmatpush.bf16.msra.mxu0 %v285_v28  ;;  %313 = vmatpush.bf16.msra.mxu1 %v288_v29 }
  0x9a   : > { %326 = vmatpush.bf16.msra.mxu2 %v291_v30 }
  0x9c   : > { %1730 = vmatmul.msk.bf16.vlgmr.msra.gmra.mxu0 %vm279_vm1, %v1729_v32  ;;  %1731 = vmatmul.msk.bf16.vlgmr.msra.gmra.mxu1 %vm279_vm1, %v1729_v32 }
  0x9d   : > { %367 = vmatpush.bf16.msrb.mxu0 %v342_v23  ;;  %380 = vmatpush.bf16.msrb.mxu1 %v345_v31 }
  0x9e   : > { %419 = vmatpush.bf16.msrb.mxu2 %v404_v27  ;;  %v393_v34 = vpop.permute.xlu0 %392  ;;  %v395_v35 = vpop.permute.xlu1 %394 }
  0x9f   : > { %1732 = vmatmul.msk.bf16.vlgmr.msra.gmra.mxu2 %vm279_vm1, %v1729_v32  ;;  %v398_v36 = vsel %vm396_vm2, %v391_v13, %v393_v34  ;;  %v399_v37 = vsel %vm396_vm2, %v393_v34, %v395_v35  ;;  %v595_v56 = vpop.permute.xlu2 %594 }
  0xa0   : > { %v407_v38 = vsel %vm283_vm0, %v398_v36, 0  ;;  %v410_v39 = vsel %vm283_vm0, %v399_v37, 0 }
  0xa1   : > { %432 = vmatpush.bf16.msrb.mxu3 %v407_v38  ;;  %445 = vmatpush.bf16.msra.mxu0 %v410_v39  ;;  %v1756_v39 = vld [vmem:[%s2405_s1 + $0x1c] sm:$0xf] }
  0xa4   : > { %1738 = vmatmul.msk.bf16.vlgmr.msrb.gmra.mxu3 %vm279_vm1, %v1736_v40 }
  0xa6   : > { %v461_v42 = vpop.permute.xlu1 %460  ;;  %v459_v43 = vpop.permute.xlu0 %458 }
  0xa7   : > { %v467_v44 = vsel %vm464_vm4, %v461_v42, %v463_v33  ;;  %v465_v45 = vsel %vm464_vm4, %v457_v18, %v459_v43  ;;  %v466_v46 = vsel %vm464_vm4, %v459_v43, %v461_v42  ;;  %v661_v0 = vpop.permute.xlu2 %660  ;;  %v862_v42 = vld [vmem:[%s2406_s2] sm:$0xff]  ;;  %v1968_v43 = vmov 0  }
  0xa8   : > { %v478_v47 = vsel %vm283_vm0, %v467_v44, 0  ;;  %v472_v48 = vsel %vm283_vm0, %v465_v45, 0  ;;  %v475_v49 = vsel %vm283_vm0, %v466_v46, 0  ;;  %1860 = vset.pattern.permute.xlu2 %v1968_v43  ;;  %1871 = vset.pattern.permute.xlu0 %v1968_v43 }
  0xa9   : > { %513 = vmatpush.bf16.msra.mxu3 %v478_v47  ;;  %487 = vmatpush.bf16.msra.mxu1 %v472_v48 }
  0xaa   : > { %500 = vmatpush.bf16.msra.mxu2 %v475_v49  ;;  %865 = vperm.xlu2 %1860, %v862_v42  }
  0xac   : > { %1734 = vmatmul.msk.bf16.vlgmr.msrb.gmra.mxu0 %vm279_vm1, %v251_v11  ;;  %1735 = vmatmul.msk.bf16.vlgmr.msrb.gmra.mxu1 %vm279_vm1, %v251_v11 }
  0xae   : > { %v527_v50 = vpop.permute.xlu1 %526  ;;  %v525_v51 = vpop.permute.xlu0 %524 }
  0xaf   : > { %1737 = vmatmul.msk.bf16.vlgmr.msrb.gmra.mxu2 %vm279_vm1, %v1736_v40  ;;  %v534_v52 = vsel %vm532_vm5, %v527_v50, %v529_v41  ;;  %v533_v53 = vsel %vm532_vm5, %v525_v51, %v527_v50  ;;  %v667_v8 = vpop.permute.xlu2 %666 }
  0xb0   : > { %v543_v54 = vsel %vm283_vm0, %v534_v52, 0  ;;  %v540_v55 = vsel %vm283_vm0, %v533_v53, 0 }
  0xb1   : > { %555 = vmatpush.bf16.msrb.mxu0 %v540_v55  ;;  %568 = vmatpush.bf16.msrb.mxu1 %v543_v54 }
  0xb4   : > { %1743 = vmatmul.msk.bf16.vlgmr.msra.gmra.mxu3 %vm279_vm1, %v1740_v57 }
  0xb6   : > { %v593_v58 = vpop.permute.xlu1 %592  ;;  %v531_v59 = vpop.permute.xlu0 %530 }
  0xb7   : > { %v601_v60 = vsel %vm600_vm6, %v593_v58, %v595_v56  ;;  %v535_v61 = vsel %vm532_vm5, %v529_v41, %v531_v59  ;;  %v733_v18 = vpop.permute.xlu2 %732  ;;  %v356_v41 = vpop.f32.mrf.mxu3 }
  0xb8   : > { %v608_v62 = vsel %vm283_vm0, %v601_v60, 0  ;;  %v546_v63 = vsel %vm283_vm0, %v535_v61, 0 }
  0xb9   : > { %623 = vmatpush.bf16.msrb.mxu3 %v608_v62  ;;  %581 = vmatpush.bf16.msrb.mxu2 %v546_v63 }
  0xbc   : > { %1739 = vmatmul.msk.bf16.vlgmr.msra.gmra.mxu0 %vm279_vm1, %v1736_v40  ;;  %1741 = vmatmul.msk.bf16.vlgmr.msra.gmra.mxu1 %vm279_vm1, %v1740_v57  ;;  %v1760_v40 = vld [vmem:[%s2405_s1 + $0x20] sm:$0xf] }
  0xbe   : > { %v599_v1 = vpop.permute.xlu1 %598  ;;  %v597_v2 = vpop.permute.xlu0 %596 }
  0xbf   : > { %1742 = vmatmul.msk.bf16.vlgmr.msra.gmra.mxu2 %vm279_vm1, %v1740_v57  ;;  %v602_v3 = vsel %vm600_vm6, %v595_v56, %v597_v2  ;;  %v603_v4 = vsel %vm600_vm6, %v597_v2, %v599_v1  ;;  %v799_v26 = vpop.permute.xlu2 %798  ;;  %v358_v44 = vpop.f32.mrf.mxu3 }
  0xc0   : > { %v611_v5 = vsel %vm283_vm0, %v602_v3, 0  ;;  %v614_v6 = vsel %vm283_vm0, %v603_v4, 0 }
  0xc1   : > { %636 = vmatpush.bf16.msra.mxu0 %v611_v5  ;;  %649 = vmatpush.bf16.msra.mxu1 %v614_v6 }
  0xc4   : > { %1749 = vmatmul.msk.bf16.vlgmr.msrb.gmra.mxu3 %vm279_vm1, %v1748_v7 }
  0xc6   : > { %v665_v9 = vpop.permute.xlu1 %664  ;;  %v663_v10 = vpop.permute.xlu0 %662 }
  0xc7   : > { %v669_v11 = vsel %vm2413_vm7, %v661_v0, %v663_v10  ;;  %v670_v12 = vsel %vm2413_vm7, %v663_v10, %v665_v9  ;;  %v671_v13 = vsel %vm2413_vm7, %v665_v9, %v667_v8 }
  0xc8   : > { %v676_v14 = vsel %vm283_vm0, %v669_v11, 0  ;;  %v679_v15 = vsel %vm283_vm0, %v670_v12, 0  ;;  %v682_v17 = vsel %vm283_vm0, %v671_v13, 0 }
  0xc9   : > { %704 = vmatpush.bf16.msra.mxu3 %v679_v15  ;;  %691 = vmatpush.bf16.msra.mxu2 %v676_v14 }
  0xcc   : > { %1745 = vmatmul.msk.bf16.vlgmr.msrb.gmra.mxu0 %vm279_vm1, %v1744_v16  ;;  %1746 = vmatmul.msk.bf16.vlgmr.msrb.gmra.mxu1 %vm279_vm1, %v1744_v16 }
  0xcd   : > { %717 = vmatpush.bf16.msrb.mxu0 %v682_v17 }
  0xce   : > { %v729_v19 = vpop.permute.xlu0 %728  ;;  %v731_v20 = vpop.permute.xlu1 %730 }
  0xcf   : > { %1747 = vmatmul.msk.bf16.vlgmr.msrb.gmra.mxu2 %vm279_vm1, %v1744_v16  ;;  %v737_v21 = vsel %vm2412_vm8, %v729_v19, %v731_v20  ;;  %v738_v22 = vsel %vm2412_vm8, %v731_v20, %v733_v18 }
  0xd0   : > { %v744_v23 = vsel %vm283_vm0, %v737_v21, 0  ;;  %v747_v24 = vsel %vm283_vm0, %v738_v22, 0 }
  0xd1   : > { %759 = vmatpush.bf16.msrb.mxu1 %v744_v23  ;;  %772 = vmatpush.bf16.msrb.mxu2 %v747_v24 }
  0xd4   : > { %1754 = vmatmul.msk.bf16.vlgmr.msra.gmra.mxu3 %vm279_vm1, %v1752_v25 }
  0xd6   : > { %v735_v27 = vpop.permute.xlu0 %734  ;;  %v797_v28 = vpop.permute.xlu1 %796 }
  0xd7   : > { %v739_v29 = vsel %vm2412_vm8, %v733_v18, %v735_v27  ;;  %v805_v30 = vsel %vm2411_vm9, %v797_v28, %v799_v26  ;;  %v1969_v18 = vmov 0.0  }
  0xd8   : > { %v750_v31 = vsel %vm283_vm0, %v739_v29, 0  ;;  %v812_v32 = vsel %vm283_vm0, %v805_v30, 0  ;;  %946 = vst.msk [vmem:[#allocation2 + $0x18] sm:$0xff] %vm945_vm10, %v1969_v18 }
  0xd9   : > { %785 = vmatpush.bf16.msrb.mxu3 %v750_v31 }
  0xdc   : > { %1750 = vmatmul.msk.bf16.vlgmr.msra.gmra.mxu0 %vm279_vm1, %v1748_v7  ;;  %1751 = vmatmul.msk.bf16.vlgmr.msra.gmra.mxu1 %vm279_vm1, %v1748_v7 }
  0xdd   : > { %827 = vmatpush.bf16.msra.mxu0 %v812_v32 }
  0xde   : > { %v803_v33 = vpop.permute.xlu1 %802  ;;  %v801_v34 = vpop.permute.xlu0 %800 }
  0xdf   : > { %1753 = vmatmul.msk.bf16.vlgmr.msra.gmra.mxu2 %vm279_vm1, %v1752_v25  ;;  %v806_v35 = vsel %vm2411_vm9, %v799_v26, %v801_v34  ;;  %v807_v36 = vsel %vm2411_vm9, %v801_v34, %v803_v33 }
  0xe0   : > { %v815_v37 = vsel %vm283_vm0, %v806_v35, 0  ;;  %v818_v38 = vsel %vm283_vm0, %v807_v36, 0 }
  0xe1   : > { %840 = vmatpush.bf16.msra.mxu1 %v815_v37  ;;  %853 = vmatpush.bf16.msra.mxu2 %v818_v38 }
  0xe4   : > { %1759 = vmatmul.msk.bf16.vlgmr.msrb.gmra.mxu3 %vm279_vm1, %v1756_v39 }
  0xec   : > { %1755 = vmatmul.msk.bf16.vlgmr.msrb.gmra.mxu0 %vm279_vm1, %v1752_v25  ;;  %1757 = vmatmul.msk.bf16.vlgmr.msrb.gmra.mxu1 %vm279_vm1, %v1756_v39 }
  0xef   : > { %1758 = vmatmul.msk.bf16.vlgmr.msrb.gmra.mxu2 %vm279_vm1, %v1756_v39 }
  0xfc   : > { %1761 = vmatmul.msk.bf16.vlgmr.msra.gmra.mxu0 %vm279_vm1, %v1760_v40  ;;  %1762 = vmatmul.msk.bf16.vlgmr.msra.gmra.mxu1 %vm279_vm1, %v1760_v40 }
  0xff   : > { %1763 = vmatmul.msk.bf16.vlgmr.msra.gmra.mxu2 %vm279_vm1, %v1760_v40 }
 0x119   : > { %v302_v45 = vpop.f32.mrf.mxu0  ;;  %v315_v46 = vpop.f32.mrf.mxu1 }
 0x11a   : > { %v357_v47 = vadd.f32 %v356_v41, %v302_v45 }
 0x121   : > { %v304_v49 = vpop.f32.mrf.mxu0  ;;  %v317_v50 = vpop.f32.mrf.mxu1 }
 0x122   : > { %v328_v48 = vpop.f32.mrf.mxu2 }
 0x127   : > { %v434_v51 = vpop.f32.mrf.mxu3 }
 0x129   : > { %v369_v53 = vpop.f32.mrf.mxu0  ;;  %v382_v54 = vpop.f32.mrf.mxu1 }
 0x12a   : > { %v330_v52 = vpop.f32.mrf.mxu2  ;;  %v370_v55 = vadd.f32 %v369_v53, %v315_v46  ;;  %v383_v56 = vadd.f32 %v382_v54, %v328_v48  ;;  %v866_v46 = vpop.permute.xlu2 %865 }
 0x12c   : > { %v452_v57 = vadd.f32 %v434_v51, %v370_v55 }
 0x12f   : > { %v436_v58 = vpop.f32.mrf.mxu3 }
 0x131   : > { %v371_v60 = vpop.f32.mrf.mxu0  ;;  %v384_v61 = vpop.f32.mrf.mxu1 }
 0x132   : > { %v421_v59 = vpop.f32.mrf.mxu2 }
 0x133   : > { %v451_v27 = vadd.f32 %v421_v59, %v357_v47 }
 0x137   : > { %v515_v62 = vpop.f32.mrf.mxu3 }
 0x139   : > { %v447_v0 = vpop.f32.mrf.mxu0  ;;  %v489_v1 = vpop.f32.mrf.mxu1 }
 0x13a   : > { %v423_v63 = vpop.f32.mrf.mxu2  ;;  %v519_v28 = vadd.f32 %v489_v1, %v451_v27  ;;  %v453_v34 = vadd.f32 %v447_v0, %v383_v56 }
 0x13c   : > { %v521_v39 = vadd.f32 %v515_v62, %v453_v34 }
 0x13f   : > { %v517_v2 = vpop.f32.mrf.mxu3 }
 0x141   : > { %v449_v4 = vpop.f32.mrf.mxu0  ;;  %v491_v5 = vpop.f32.mrf.mxu1 }
 0x142   : > { %v502_v3 = vpop.f32.mrf.mxu2 }
 0x143   : > { %v520_v29 = vadd.f32 %v502_v3, %v452_v57 }
 0x147   : > { %v625_v6 = vpop.f32.mrf.mxu3 }
 0x149   : > { %v557_v8 = vpop.f32.mrf.mxu0  ;;  %v570_v9 = vpop.f32.mrf.mxu1 }
 0x14a   : > { %v504_v7 = vpop.f32.mrf.mxu2  ;;  %v587_v31 = vadd.f32 %v557_v8, %v519_v28  ;;  %v588_v32 = vadd.f32 %v570_v9, %v520_v29 }
 0x14c   : > { %v655_v38 = vadd.f32 %v625_v6, %v587_v31 }
 0x14f   : > { %v627_v10 = vpop.f32.mrf.mxu3 }
 0x151   : > { %v559_v12 = vpop.f32.mrf.mxu0  ;;  %v572_v13 = vpop.f32.mrf.mxu1 }
 0x152   : > { %v583_v11 = vpop.f32.mrf.mxu2  ;;  %v931_v12 = vld [vmem:[%s2409_s5] sm:$0x7] }
 0x153   : > { %v589_v42 = vadd.f32 %v583_v11, %v521_v39 }
 0x157   : > { %v706_v14 = vpop.f32.mrf.mxu3 }
 0x159   : > { %v638_v16 = vpop.f32.mrf.mxu0  ;;  %v651_v17 = vpop.f32.mrf.mxu1 }
 0x15a   : > { %v585_v15 = vpop.f32.mrf.mxu2  ;;  %v656_v37 = vadd.f32 %v638_v16, %v588_v32  ;;  %v657_v47 = vadd.f32 %v651_v17, %v589_v42 }
 0x15c   : > { %v724_v40 = vadd.f32 %v706_v14, %v656_v37 }
 0x15f   : > { %v708_v19 = vpop.f32.mrf.mxu3 }
 0x161   : > { %v640_v21 = vpop.f32.mrf.mxu0  ;;  %v653_v22 = vpop.f32.mrf.mxu1 }
 0x162   : > { %v693_v20 = vpop.f32.mrf.mxu2  ;;  %v933_v21 = vperm.slane %v931_v12, 0 }
 0x163   : > { %v723_v41 = vadd.f32 %v693_v20, %v655_v38 }
 0x167   : > { %v787_v23 = vpop.f32.mrf.mxu3 }
 0x169   : > { %v719_v25 = vpop.f32.mrf.mxu0  ;;  %v761_v26 = vpop.f32.mrf.mxu1 }
 0x16a   : > { %v695_v24 = vpop.f32.mrf.mxu2  ;;  %v791_v43 = vadd.f32 %v761_v26, %v723_v41  ;;  %v725_v52 = vadd.f32 %v719_v25, %v657_v47  ;;  %v934_v26 = vperm.slane %v931_v12, 1 }
 0x16c   : > { %v793_v57 = vadd.f32 %v787_v23, %v725_v52 }
 0x16f   : > { %v789_v30 = vpop.f32.mrf.mxu3 }
 0x171   : > { %v721_v35 = vpop.f32.mrf.mxu0  ;;  %v763_v36 = vpop.f32.mrf.mxu1 }
 0x172   : > { %v774_v33 = vpop.f32.mrf.mxu2 }
 0x173   : > { %v792_v44 = vadd.f32 %v774_v33, %v724_v40 }
 0x179   : > { %v829_v48 = vpop.f32.mrf.mxu0  ;;  %v842_v49 = vpop.f32.mrf.mxu1 }
 0x17a   : > { %v776_v45 = vpop.f32.mrf.mxu2  ;;  %v859_v50 = vadd.f32 %v829_v48, %v791_v43  ;;  %v860_v51 = vadd.f32 %v842_v49, %v792_v44  ;;  %v935_v44 = vperm.slane %v931_v12, 2  ;;  %v959_v49 = vld [vmem:[#allocation2 + $0x18] sm:$0xff] }
 0x17c   : > { %v868_v53 = vadd.f32 %v866_v46, %v859_v50  ;;  %v869_v54 = vadd.f32 %v866_v46, %v860_v51  ;;  %v960_v51 = vpack.c.bf16 %v959_v49, %v959_v49 }
 0x17e   : > { %v1764_v55 = vmul.f32 -1.442695, %v868_v53  ;;  %v1765_v56 = vmul.f32 -1.442695, %v869_v54 }
 0x180   : > { %1872 = vpow2.f32 %v1764_v55 }
 0x181   : > { %1874 = vpow2.f32 %v1765_v56  ;;  %v831_v60 = vpop.f32.mrf.mxu0  ;;  %v844_v61 = vpop.f32.mrf.mxu1 }
 0x182   : > { %v855_v58 = vpop.f32.mrf.mxu2 }
 0x183   : > { %v861_v59 = vadd.f32 %v855_v58, %v793_v57 }
 0x185   : > { %v2203_v62 = vadd.f32 %v866_v46, %v861_v59 }
 0x186   : > { %v1873_v0 = vpop.eup %1872 }
 0x187   : > { %v1766_v63 = vmul.f32 -1.442695, %v2203_v62  ;;  %v1875_v1 = vpop.eup %1874  ;;  %v880_v2 = vadd.f32 1.0, %v1873_v0 }
 0x188   : > { %v881_v3 = vadd.f32 1.0, %v1875_v1 }
 0x189   : > { %1876 = vpow2.f32 %v1766_v63  ;;  %v894_v13 = vand.u32 2147483648, %v880_v2  ;;  %v892_v16 = vand.u32 2147483647, %v880_v2  ;;  %vm888_vm13 = vweird.f32 %v880_v2 }
 0x18a   : > { %v857_v4 = vpop.f32.mrf.mxu2  ;;  %1878 = vrcp.f32 %v880_v2  ;;  %v909_v17 = vand.u32 2147483648, %v881_v3  ;;  %v907_v19 = vand.u32 2147483647, %v881_v3  ;;  %vm903_vm15 = vweird.f32 %v881_v3 }
 0x18b   : > { %1880 = vrcp.f32 %v881_v3  ;;  %v895_v23 = vor.u32 1.1754944e-38, %v894_v13  ;;  %vm893_vm10 = vcmp.eq.f32.partialorder %v892_v16, 8.507059e+37  ;;  %v1774_v16 = vld [vmem:[%s2407_s3 + $0x8] sm:$0xf] }
 0x18c   : > { %v910_v28 = vor.u32 1.1754944e-38, %v909_v17  ;;  %vm908_vm8 = vcmp.eq.f32.partialorder %v907_v19, 8.507059e+37 }
 0x18f   : > { %v1877_v5 = vpop.eup %1876 }
 0x190   : > { %v882_v6 = vadd.f32 1.0, %v1877_v5  ;;  %v1879_v7 = vpop.eup %1878 }
 0x191   : > { %v1881_v8 = vpop.eup %1880  ;;  %v884_v9 = vmul.f32 %v1879_v7, %v880_v2  ;;  %vm889_vm11 = vweird.f32 %v1879_v7  ;;  %v1767_v2 = vld [vmem:[%s2407_s3 + $0x4] sm:$0xf] }
 0x192   : > { %1882 = vrcp.f32 %v882_v6  ;;  %v899_v10 = vmul.f32 %v1881_v8, %v881_v3  ;;  %vm904_vm12 = vweird.f32 %v1881_v8  ;;  %vm890_vm14 = vmor %vm888_vm13, %vm889_vm11  ;;  %v924_v34 = vand.u32 2147483648, %v882_v6 }
 0x193   : > { %v885_v11 = vsub.f32 1.0, %v884_v9  ;;  %vm905_vm9 = vmor %vm903_vm15, %vm904_vm12  ;;  %v922_v37 = vand.u32 2147483647, %v882_v6  ;;  %vm918_vm11 = vweird.f32 %v882_v6 }
 0x194   : > { %v900_v14 = vsub.f32 1.0, %v899_v10  ;;  %v925_v41 = vor.u32 1.1754944e-38, %v924_v34 }
 0x195   : > { %v886_v15 = vmul.f32 %v1879_v7, %v885_v11  ;;  %vm923_vm12 = vcmp.eq.f32.partialorder %v922_v37, 8.507059e+37 }
 0x196   : > { %v901_v18 = vmul.f32 %v1881_v8, %v900_v14 }
 0x197   : > { %v887_v22 = vadd.f32 %v1879_v7, %v886_v15 }
 0x198   : > { %v1883_v20 = vpop.eup %1882  ;;  %v902_v24 = vadd.f32 %v1881_v8, %v901_v18 }
 0x199   : > { %v914_v25 = vmul.f32 %v1883_v20, %v882_v6  ;;  %v891_v27 = vsel %vm890_vm14, %v1879_v7, %v887_v22  ;;  %vm919_vm7 = vweird.f32 %v1883_v20 }
 0x19a   : > { %v896_v29 = vsel %vm893_vm10, %v895_v23, %v891_v27  ;;  %v906_v30 = vsel %vm905_vm9, %v1881_v8, %v902_v24  ;;  %vm920_vm13 = vmor %vm918_vm11, %vm919_vm7 }
 0x19b   : > { %v915_v31 = vsub.f32 1.0, %v914_v25  ;;  %v911_v32 = vsel %vm908_vm8, %v910_v28, %v906_v30  ;;  %v928_v33 = vmul.f32 %v896_v29, %v868_v53  ;;  %v1547_v53 = vld [vmem:[%s2408_s4] sm:$0xff]  ;;  %vm2422_vm8 = vcmask 736256  }
 0x19c   : > { %v929_v35 = vmul.f32 %v911_v32, %v869_v54  ;;  %v950_v54 = vld [vmem:[%s2407_s3] sm:$0xf]  ;;  %vm2423_vm9 = vmmov %vm2422_vm8 }
 0x19d   : > { %v916_v36 = vmul.f32 %v1883_v20, %v915_v31  ;;  %v939_v38 = vmul.f32 %v933_v21, %v928_v33  ;;  %v1778_v33 = vld [vmem:[%s2407_s3 + $0xc] sm:$0xf]  ;;  %vm2424_vm14 = vmmov %vm2422_vm8 }
 0x19e   : > { %v940_v39 = vmul.f32 %v934_v26, %v929_v35  ;;  %vm2425_vm11 = vmmov %vm2422_vm8 }
 0x19f   : > { %v917_v40 = vadd.f32 %v1883_v20, %v916_v36  ;;  %v954_v42 = vpack.c.bf16 %v939_v38, %v939_v38 }
 0x1a0   : > { %v955_v45 = vpack.c.bf16 %v940_v39, %v940_v39 }
 0x1a1   : > { %v921_v43 = vsel %vm920_vm13, %v1883_v20, %v917_v40  ;;  %965 = vrot.lane.b32.xlu0 %v954_v42, %s1960_s14  ;;  %v1031_v47 = vsel %vm283_vm0, %v954_v42, 0 }
 0x1a2   : > { %v926_v46 = vsel %vm923_vm12, %v925_v41, %v921_v43  ;;  %967 = vrot.lane.b32.xlu1 %v955_v45, %s1960_s14  ;;  %1046 = vmatpush.bf16.msrb.mxu2 %v1031_v47  ;;  %v1034_v0 = vsel %vm283_vm0, %v955_v45, 0  ;;  %v1786_v47 = vld [vmem:[%s2407_s3 + $0x14] sm:$0xf] }
 0x1a3   : > { %v930_v48 = vmul.f32 %v926_v46, %v2203_v62 }
 0x1a5   : > { %v941_v50 = vmul.f32 %v935_v44, %v930_v48  ;;  %1771 = vmatmul.msk.bf16.vlgmr.msrb.gmra.mxu2 %vm279_vm1, %v950_v54  ;;  %v1782_v48 = vld [vmem:[%s2407_s3 + $0x10] sm:$0xf] }
 0x1a7   : > { %v956_v52 = vpack.c.bf16 %v941_v50, %v941_v50 }
 0x1a9   : > { %969 = vrot.lane.b32.xlu2 %v956_v52, %s1960_s14  ;;  %971 = vrot.lane.b32.xlu0 %v960_v51, %s1960_s14  ;;  %v1037_v1 = vsel %vm283_vm0, %v956_v52, 0 }
 0x1aa   : > { %1080 = vrot.lane.b32.xlu1 %v954_v42, %s1961_s15 }
 0x1b1   : > { %1082 = vrot.lane.b32.xlu2 %v955_v45, %s1961_s15  ;;  %1084 = vrot.lane.b32.xlu0 %v956_v52, %s1961_s15 }
 0x1b2   : > { %1086 = vrot.lane.b32.xlu1 %v960_v51, %s1961_s15  ;;  %s1910_s15 = sshra.s32 %s1664_s10, 4  ;;  %s1911_s15 = int_to_ptr.hbm [resolvable:$true] %s1910_s15 }
 0x1b3   : > { %p1917_p0 = scmp.lt.s32.totalorder %s1911_s15, %s2410_s6 }
 0x1b9   : > { %1147 = vrot.lane.b32.xlu2 %v954_v42, %s1962_s16  ;;  %1149 = vrot.lane.b32.xlu0 %v955_v45, %s1962_s16 }
 0x1ba   : > { %1151 = vrot.lane.b32.xlu1 %v956_v52, %s1962_s16 }
 0x1c1   : > { %1153 = vrot.lane.b32.xlu2 %v960_v51, %s1962_s16  ;;  %1214 = vrot.lane.b32.xlu0 %v954_v42, %s1963_s17  ;;  %s1912_s16 = scalar_lea.hbm %s1911_s15, 24 }
 0x1c2   : > { %1216 = vrot.lane.b32.xlu1 %v955_v45, %s1963_s17  ;;  %p1913_p11 = scmp.ne.s32.totalorder %s1911_s15, %s1912_s16 }
 0x1c4   : > { %p1914_p12 = pnand %p1913_p11, %p2043_p5 }
 0x1c6   : > { %p1915_p13 = pneg %p1914_p12 }
 0x1c9   : > { %1218 = vrot.lane.b32.xlu2 %v956_v52, %s1963_s17  ;;  %1220 = vrot.lane.b32.xlu0 %v960_v51, %s1963_s17 }
 0x1ca   : > { %1281 = vrot.lane.b32.xlu1 %v954_v42, %s1964_s18 }
 0x1d1   : > { %1283 = vrot.lane.b32.xlu2 %v955_v45, %s1964_s18  ;;  %1285 = vrot.lane.b32.xlu0 %v956_v52, %s1964_s18 }
 0x1d2   : > { %1287 = vrot.lane.b32.xlu1 %v960_v51, %s1964_s18 }
 0x1d9   : > { %1348 = vrot.lane.b32.xlu2 %v954_v42, %s1965_s19  ;;  %1350 = vrot.lane.b32.xlu0 %v955_v45, %s1965_s19 }
 0x1da   : > { %1352 = vrot.lane.b32.xlu1 %v956_v52, %s1965_s19 }
 0x1e1   : > { %1354 = vrot.lane.b32.xlu2 %v960_v51, %s1965_s19  ;;  %1415 = vrot.lane.b32.xlu0 %v954_v42, %s1966_s20  ;;  %s1916_s19 = scalar_lea.hbm %s2410_s6, 48 }
 0x1e2   : > { %1417 = vrot.lane.b32.xlu1 %v955_v45, %s1966_s20  ;;  %p1918_p1 = scmp.lt.s32.totalorder %s1916_s19, %s1912_s16 }
 0x1e4   : > { %p1919_p2 = por %p1918_p1, %p1917_p0 }
 0x1e6   : > { %p1920_p3 = pnand %p1919_p2, %p1915_p13 }
 0x1e9   : > { %1419 = vrot.lane.b32.xlu2 %v956_v52, %s1966_s20  ;;  %1421 = vrot.lane.b32.xlu0 %v960_v51, %s1966_s20 }
 0x1ea   : > { %1482 = vrot.lane.b32.xlu1 %v954_v42, %s1967_s26 }
 0x1f1   : > { %1484 = vrot.lane.b32.xlu2 %v955_v45, %s1967_s26  ;;  %1486 = vrot.lane.b32.xlu0 %v956_v52, %s1967_s26 }
 0x1f2   : > { %1488 = vrot.lane.b32.xlu1 %v960_v51, %s1967_s26 }
 0x1f9   : > { %1550 = vperm.xlu2 %1860, %v1547_v53  }
 0x203   : > { %v970_v55 = vpop.permute.xlu2 %969 }
 0x20b   : > { %v1083_v56 = vpop.permute.xlu2 %1082 }
 0x213   : > { %v966_v57 = vpop.permute.xlu0 %965  ;;  %v1148_v61 = vpop.permute.xlu2 %1147 }
 0x214   : > { %v968_v58 = vpop.permute.xlu1 %967 }
 0x215   : > { %v974_v59 = vsel %vm275_vm3, %v968_v58, %v970_v55  ;;  %v973_v60 = vsel %vm275_vm3, %v966_v57, %v968_v58 }
 0x216   : > { %v983_v62 = vsel %vm283_vm0, %v974_v59, 0  ;;  %v980_v63 = vsel %vm283_vm0, %v973_v60, 0 }
 0x217   : > { %995 = vmatpush.bf16.msra.mxu3 %v980_v63  ;;  %1008 = vmatpush.bf16.msrb.mxu0 %v983_v62 }
 0x21a   : > { %1769 = vmatmul.msk.bf16.vlgmr.msrb.gmra.mxu0 %vm279_vm1, %v1767_v2  ;;  %1768 = vmatmul.msk.bf16.vlgmr.msra.gmra.mxu3 %vm279_vm1, %v1767_v2 }
 0x21b   : > { %1059 = vmatpush.bf16.msrb.mxu3 %v1034_v0  ;;  %1072 = vmatpush.bf16.msra.mxu0 %v1037_v1  ;;  %v972_v3 = vpop.permute.xlu0 %971  ;;  %v1154_v9 = vpop.permute.xlu2 %1153  ;;  %v1790_v1 = vld [vmem:[%s2407_s3 + $0x18] sm:$0xf] }
 0x21c   : > { %v1081_v4 = vpop.permute.xlu1 %1080  ;;  %v975_v5 = vsel %vm275_vm3, %v970_v55, %v972_v3 }
 0x21d   : > { %v1088_v6 = vsel %vm396_vm2, %v1081_v4, %v1083_v56  ;;  %v986_v7 = vsel %vm283_vm0, %v975_v5, 0 }
 0x21e   : > { %v1095_v8 = vsel %vm283_vm0, %v1088_v6, 0  ;;  %1021 = vmatpush.bf16.msrb.mxu1 %v986_v7 }
 0x221   : > { %1770 = vmatmul.msk.bf16.vlgmr.msrb.gmra.mxu1 %vm279_vm1, %v1767_v2 }
 0x222   : > { %1110 = vmatpush.bf16.msra.mxu1 %v1095_v8 }
 0x223   : > { %v1085_v10 = vpop.permute.xlu0 %1084  ;;  %v1219_v17 = vpop.permute.xlu2 %1218 }
 0x224   : > { %v1087_v11 = vpop.permute.xlu1 %1086  ;;  %v1089_v12 = vsel %vm396_vm2, %v1083_v56, %v1085_v10 }
 0x225   : > { %v1090_v13 = vsel %vm396_vm2, %v1085_v10, %v1087_v11  ;;  %v1098_v14 = vsel %vm283_vm0, %v1089_v12, 0  ;;  %vm2416_vm2 = vcmask 752640  }
 0x226   : > { %v1101_v15 = vsel %vm283_vm0, %v1090_v13, 0  ;;  %1123 = vmatpush.bf16.msra.mxu2 %v1098_v14  ;;  %vm2417_vm3 = vmmov %vm2416_vm2 }
 0x227   : > { %1136 = vmatpush.bf16.msra.mxu3 %v1101_v15  ;;  %v1794_v15 = vld [vmem:[%s2407_s3 + $0x1c] sm:$0xf] }
 0x229   : > { %1776 = vmatmul.msk.bf16.vlgmr.msra.gmra.mxu2 %vm279_vm1, %v1774_v16 }
 0x22a   : > { %1773 = vmatmul.msk.bf16.vlgmr.msra.gmra.mxu0 %vm279_vm1, %v950_v54  ;;  %1772 = vmatmul.msk.bf16.vlgmr.msrb.gmra.mxu3 %vm279_vm1, %v950_v54 }
 0x22b   : > { %v1150_v18 = vpop.permute.xlu0 %1149  ;;  %v1284_v27 = vpop.permute.xlu2 %1283 }
 0x22c   : > { %v1152_v19 = vpop.permute.xlu1 %1151  ;;  %v1155_v20 = vsel %vm464_vm4, %v1148_v61, %v1150_v18 }
 0x22d   : > { %v1157_v21 = vsel %vm464_vm4, %v1152_v19, %v1154_v9  ;;  %v1156_v22 = vsel %vm464_vm4, %v1150_v18, %v1152_v19  ;;  %v1162_v23 = vsel %vm283_vm0, %v1155_v20, 0  ;;  %vm2418_vm4 = vmmov %vm2416_vm2  ;;  %v1616_v18 = vld [vmem:[%s2058_s13] sm:$0xff]  ;;  %v1048_v19 = vpop.f32.mrf.mxu2 }
 0x22e   : > { %v1168_v24 = vsel %vm283_vm0, %v1157_v21, 0  ;;  %v1165_v25 = vsel %vm283_vm0, %v1156_v22, 0  ;;  %1177 = vmatpush.bf16.msrb.mxu0 %v1162_v23  ;;  %v1618_v22 = vunpack.c.l.bf16 %v1616_v18  ;;  %v1619_v23 = vunpack.c.h.bf16 %v1616_v18 }
 0x22f   : > { %1190 = vmatpush.bf16.msrb.mxu1 %v1165_v25  ;;  %1203 = vmatpush.bf16.msrb.mxu2 %v1168_v24 }
 0x230   : > { %v1861_v25 = vpack.i.bf16 %v1619_v23, %v1618_v22 }
 0x231   : > { %1775 = vmatmul.msk.bf16.vlgmr.msra.gmra.mxu1 %vm279_vm1, %v1774_v16 }
 0x232   : > { %1862 = vrot.lane.b32.xlu0 %v1861_v25, %s1967_s26 }
 0x233   : > { %v1215_v26 = vpop.permute.xlu0 %1214  ;;  %v1349_v39 = vpop.permute.xlu2 %1348 }
 0x234   : > { %v1217_v28 = vpop.permute.xlu1 %1216 }
 0x235   : > { %v1223_v29 = vsel %vm532_vm5, %v1217_v28, %v1219_v17  ;;  %v1222_v30 = vsel %vm532_vm5, %v1215_v26, %v1217_v28  ;;  %v1050_v26 = vpop.f32.mrf.mxu2 }
 0x236   : > { %v1232_v31 = vsel %vm283_vm0, %v1223_v29, 0  ;;  %v1229_v32 = vsel %vm283_vm0, %v1222_v30, 0 }
 0x237   : > { %1244 = vmatpush.bf16.msrb.mxu3 %v1229_v32  ;;  %1257 = vmatpush.bf16.msra.mxu0 %v1232_v31 }
 0x239   : > { %1781 = vmatmul.msk.bf16.vlgmr.msrb.gmra.mxu2 %vm279_vm1, %v1778_v33 }
 0x23a   : > { %1777 = vmatmul.msk.bf16.vlgmr.msra.gmra.mxu3 %vm279_vm1, %v1774_v16  ;;  %1779 = vmatmul.msk.bf16.vlgmr.msrb.gmra.mxu0 %vm279_vm1, %v1778_v33  ;;  %v1798_v16 = vld [vmem:[%s2407_s3 + $0x20] sm:$0xf] }
 0x23b   : > { %v1221_v34 = vpop.permute.xlu0 %1220  ;;  %v1355_v49 = vpop.permute.xlu2 %1354 }
 0x23c   : > { %v1282_v35 = vpop.permute.xlu1 %1281  ;;  %v1224_v36 = vsel %vm532_vm5, %v1219_v17, %v1221_v34  ;;  %vm2419_vm5 = vcmask 744448   ;;  %v1617_v17 = vld [vmem:[%s2058_s13 + $0x8] sm:$0xff]  ;;  %s242_s13 = sand.u32 1, %s1950_s22  }
 0x23d   : > { %v1289_v37 = vsel %vm600_vm6, %v1282_v35, %v1284_v27  ;;  %v1235_v38 = vsel %vm283_vm0, %v1224_v36, 0  ;;  %vm2421_vm7 = vmmov %vm2419_vm5  ;;  %v1620_v20 = vunpack.c.l.bf16 %v1617_v17  ;;  %v1621_v21 = vunpack.c.h.bf16 %v1617_v17  ;;  %s1648_s14 = scalar_lea.sflag [#allocation4], %s242_s13 }
 0x23e   : > { %v1296_v40 = vsel %vm283_vm0, %v1289_v37, 0  ;;  %1270 = vmatpush.bf16.msra.mxu1 %v1235_v38 }
 0x23f   : > { %1311 = vmatpush.bf16.msra.mxu2 %v1296_v40  ;;  %v1866_v24 = vpack.i.bf16 %v1621_v21, %v1620_v20 }
 0x241   : > { %1780 = vmatmul.msk.bf16.vlgmr.msrb.gmra.mxu1 %vm279_vm1, %v1778_v33  ;;  %1867 = vrot.lane.b32.xlu1 %v1866_v24, %s1967_s26  ;;  %s2363_s26 = smul.u32 24, %s242_s13 }
 0x243   : > { %v1286_v41 = vpop.permute.xlu0 %1285  ;;  %v1420_v58 = vpop.permute.xlu2 %1419  ;;  %s244_s29 = scalar_lea.vmem [#allocation3], %s2363_s26 }
 0x244   : > { %v1288_v42 = vpop.permute.xlu1 %1287  ;;  %v1290_v43 = vsel %vm600_vm6, %v1284_v27, %v1286_v41  ;;  %s1661_s9 = sshll.u32 %s244_s29, 4  ;;  %s1662_s9 = int_to_ptr.vmem [resolvable:$true] %s1661_s9 }
 0x245   : > { %v1291_v44 = vsel %vm600_vm6, %v1286_v41, %v1288_v42  ;;  %v1299_v45 = vsel %vm283_vm0, %v1290_v43, 0  ;;  %vm2420_vm6 = vmmov %vm2419_vm5 }
 0x246   : > { %v1302_v46 = vsel %vm283_vm0, %v1291_v44, 0  ;;  %1324 = vmatpush.bf16.msra.mxu3 %v1299_v45 }
 0x247   : > { %1337 = vmatpush.bf16.msrb.mxu0 %v1302_v46 }
 0x249   : > { %1787 = vmatmul.msk.bf16.vlgmr.msra.gmra.mxu2 %vm279_vm1, %v1786_v47 }
 0x24a   : > { %1783 = vmatmul.msk.bf16.vlgmr.msrb.gmra.mxu3 %vm279_vm1, %v1782_v48  ;;  %1784 = vmatmul.msk.bf16.vlgmr.msra.gmra.mxu0 %vm279_vm1, %v1782_v48 }
 0x24b   : > { %v1351_v50 = vpop.permute.xlu0 %1350  ;;  %v1485_v3 = vpop.permute.xlu2 %1484 }
 0x24c   : > { %v1353_v51 = vpop.permute.xlu1 %1352  ;;  %v1356_v52 = vsel %vm2416_vm2, %v1349_v39, %v1351_v50 }
 0x24d   : > { %v1358_v53 = vsel %vm2417_vm3, %v1353_v51, %v1355_v49  ;;  %v1357_v54 = vsel %vm2418_vm4, %v1351_v50, %v1353_v51  ;;  %v1363_v55 = vsel %vm283_vm0, %v1356_v52, 0 }
 0x24e   : > { %v1369_v56 = vsel %vm283_vm0, %v1358_v53, 0  ;;  %v1366_v57 = vsel %vm283_vm0, %v1357_v54, 0  ;;  %1378 = vmatpush.bf16.msrb.mxu1 %v1363_v55 }
 0x24f   : > { %1391 = vmatpush.bf16.msrb.mxu2 %v1366_v57  ;;  %1404 = vmatpush.bf16.msrb.mxu3 %v1369_v56 }
 0x251   : > { %1785 = vmatmul.msk.bf16.vlgmr.msra.gmra.mxu1 %vm279_vm1, %v1782_v48 }
 0x253   : > { %v1416_v59 = vpop.permute.xlu0 %1415 }
 0x254   : > { %v1418_v60 = vpop.permute.xlu1 %1417 }
 0x255   : > { %v1424_v61 = vsel %vm2419_vm5, %v1418_v60, %v1420_v58  ;;  %v1423_v62 = vsel %vm2420_vm6, %v1416_v59, %v1418_v60 }
 0x256   : > { %v1433_v63 = vsel %vm283_vm0, %v1424_v61, 0  ;;  %v1430_v0 = vsel %vm283_vm0, %v1423_v62, 0 }
 0x257   : > { %1445 = vmatpush.bf16.msra.mxu0 %v1430_v0  ;;  %1458 = vmatpush.bf16.msra.mxu1 %v1433_v63 }
 0x259   : > { %1792 = vmatmul.msk.bf16.vlgmr.msrb.gmra.mxu2 %vm279_vm1, %v1790_v1 }
 0x25a   : > { %1788 = vmatmul.msk.bf16.vlgmr.msra.gmra.mxu3 %vm279_vm1, %v1786_v47  ;;  %1789 = vmatmul.msk.bf16.vlgmr.msrb.gmra.mxu0 %vm279_vm1, %v1786_v47 }
 0x25b   : > { %v1422_v2 = vpop.permute.xlu0 %1421 }
 0x25c   : > { %v1483_v4 = vpop.permute.xlu1 %1482  ;;  %v1425_v5 = vsel %vm2421_vm7, %v1420_v58, %v1422_v2 }
 0x25d   : > { %v1490_v6 = vsel %vm2422_vm8, %v1483_v4, %v1485_v3  ;;  %v1436_v7 = vsel %vm283_vm0, %v1425_v5, 0 }
 0x25e   : > { %v1497_v8 = vsel %vm283_vm0, %v1490_v6, 0  ;;  %1471 = vmatpush.bf16.msra.mxu2 %v1436_v7 }
 0x25f   : > { %1512 = vmatpush.bf16.msra.mxu3 %v1497_v8 }
 0x261   : > { %1791 = vmatmul.msk.bf16.vlgmr.msrb.gmra.mxu1 %vm279_vm1, %v1790_v1 }
 0x263   : > { %v1487_v9 = vpop.permute.xlu0 %1486 }
 0x264   : > { %v1489_v10 = vpop.permute.xlu1 %1488  ;;  %v1491_v11 = vsel %vm2423_vm9, %v1485_v3, %v1487_v9  ;;  %vm2426_vm9 = vmmov %vm2422_vm8 }
 0x265   : > { %v1492_v12 = vsel %vm2424_vm14, %v1487_v9, %v1489_v10  ;;  %v1500_v13 = vsel %vm283_vm0, %v1491_v11, 0 }
 0x266   : > { %v1503_v14 = vsel %vm283_vm0, %v1492_v12, 0  ;;  %1525 = vmatpush.bf16.msrb.mxu0 %v1500_v13 }
 0x267   : > { %1538 = vmatpush.bf16.msrb.mxu1 %v1503_v14 }
 0x269   : > { %1797 = vmatmul.msk.bf16.vlgmr.msra.gmra.mxu2 %vm279_vm1, %v1794_v15 }
 0x26a   : > { %1793 = vmatmul.msk.bf16.vlgmr.msrb.gmra.mxu3 %vm279_vm1, %v1790_v1  ;;  %1795 = vmatmul.msk.bf16.vlgmr.msra.gmra.mxu0 %vm279_vm1, %v1794_v15 }
 0x271   : > { %1796 = vmatmul.msk.bf16.vlgmr.msra.gmra.mxu1 %vm279_vm1, %v1794_v15 }
 0x27a   : > { %1799 = vmatmul.msk.bf16.vlgmr.msra.gmra.mxu3 %vm279_vm1, %v1798_v16  ;;  %1800 = vmatmul.msk.bf16.vlgmr.msrb.gmra.mxu0 %vm279_vm1, %v1798_v16 }
 0x281   : > { %1801 = vmatmul.msk.bf16.vlgmr.msrb.gmra.mxu1 %vm279_vm1, %v1798_v16 }
 0x297   : > { %v1010_v27 = vpop.f32.mrf.mxu0 }
 0x29d   : > { %v997_v28 = vpop.f32.mrf.mxu3 }
 0x29e   : > { %v1023_v29 = vpop.f32.mrf.mxu1  ;;  %v1049_v30 = vadd.f32 %v1048_v19, %v997_v28  ;;  %v1551_v28 = vpop.permute.xlu2 %1550 }
 0x29f   : > { %v1012_v31 = vpop.f32.mrf.mxu0 }
 0x2a5   : > { %v999_v32 = vpop.f32.mrf.mxu3 }
 0x2a6   : > { %v1025_v33 = vpop.f32.mrf.mxu1 }
 0x2a7   : > { %v1074_v34 = vpop.f32.mrf.mxu0 }
 0x2a8   : > { %v1075_v35 = vadd.f32 %v1074_v34, %v1023_v29 }
 0x2ac   : > { %v1125_v36 = vpop.f32.mrf.mxu2 }
 0x2ad   : > { %v1061_v37 = vpop.f32.mrf.mxu3 }
 0x2ae   : > { %v1112_v38 = vpop.f32.mrf.mxu1  ;;  %v1062_v3 = vadd.f32 %v1061_v37, %v1010_v27 }
 0x2af   : > { %v1076_v39 = vpop.f32.mrf.mxu0  ;;  %v1142_v40 = vadd.f32 %v1112_v38, %v1049_v30 }
 0x2b0   : > { %v1143_v6 = vadd.f32 %v1125_v36, %v1062_v3 }
 0x2b4   : > { %v1127_v41 = vpop.f32.mrf.mxu2 }
 0x2b5   : > { %v1063_v42 = vpop.f32.mrf.mxu3 }
 0x2b6   : > { %v1114_v43 = vpop.f32.mrf.mxu1 }
 0x2b7   : > { %v1179_v44 = vpop.f32.mrf.mxu0 }
 0x2b8   : > { %v1209_v15 = vadd.f32 %v1179_v44, %v1142_v40 }
 0x2bc   : > { %v1205_v45 = vpop.f32.mrf.mxu2 }
 0x2bd   : > { %v1138_v46 = vpop.f32.mrf.mxu3 }
 0x2be   : > { %v1192_v47 = vpop.f32.mrf.mxu1  ;;  %v1144_v12 = vadd.f32 %v1138_v46, %v1075_v35 }
 0x2bf   : > { %v1181_v48 = vpop.f32.mrf.mxu0  ;;  %v1210_v7 = vadd.f32 %v1192_v47, %v1143_v6 }
 0x2c0   : > { %v1211_v16 = vadd.f32 %v1205_v45, %v1144_v12 }
 0x2c4   : > { %v1207_v49 = vpop.f32.mrf.mxu2 }
 0x2c5   : > { %v1140_v50 = vpop.f32.mrf.mxu3 }
 0x2c6   : > { %v1194_v51 = vpop.f32.mrf.mxu1 }
 0x2c7   : > { %v1259_v52 = vpop.f32.mrf.mxu0 }
 0x2c8   : > { %v1277_v10 = vadd.f32 %v1259_v52, %v1210_v7 }
 0x2cc   : > { %v1313_v53 = vpop.f32.mrf.mxu2 }
 0x2cd   : > { %v1246_v54 = vpop.f32.mrf.mxu3 }
 0x2ce   : > { %v1272_v55 = vpop.f32.mrf.mxu1  ;;  %v1276_v17 = vadd.f32 %v1246_v54, %v1209_v15  ;;  %v1868_v54 = vpop.permute.xlu1 %1867 }
 0x2cf   : > { %v1261_v56 = vpop.f32.mrf.mxu0  ;;  %v1278_v20 = vadd.f32 %v1272_v55, %v1211_v16  ;;  %v1863_v55 = vpop.permute.xlu0 %1862 }
 0x2d0   : > { %v1343_v26 = vadd.f32 %v1313_v53, %v1276_v17  ;;  %v1864_v16 = vunpack.i.l.bf16 %v1863_v55 }
 0x2d4   : > { %v1315_v57 = vpop.f32.mrf.mxu2 }
 0x2d5   : > { %v1248_v58 = vpop.f32.mrf.mxu3 }
 0x2d6   : > { %v1274_v59 = vpop.f32.mrf.mxu1  ;;  %v1869_v58 = vunpack.i.l.bf16 %v1868_v54 }
 0x2d7   : > { %v1339_v60 = vpop.f32.mrf.mxu0 }
 0x2d8   : > { %v1345_v24 = vadd.f32 %v1339_v60, %v1278_v20 }
 0x2dc   : > { %v1393_v61 = vpop.f32.mrf.mxu2 }
 0x2dd   : > { %v1326_v62 = vpop.f32.mrf.mxu3 }
 0x2de   : > { %v1380_v63 = vpop.f32.mrf.mxu1  ;;  %v1344_v14 = vadd.f32 %v1326_v62, %v1277_v10 }
 0x2df   : > { %v1341_v0 = vpop.f32.mrf.mxu0  ;;  %v1410_v30 = vadd.f32 %v1380_v63, %v1343_v26 }
 0x2e0   : > { %v1411_v18 = vadd.f32 %v1393_v61, %v1344_v14  ;;  %v1865_v61 = vunpack.i.h.bf16 %v1863_v55 }
 0x2e2   : > { %v1636_v6 = vsel %vm2425_vm11, %v1865_v61, %v1869_v58  ;;  %v1635_v26 = vsel %vm2422_vm8, %v1864_v16, %v1865_v61 }
 0x2e4   : > { %v1395_v1 = vpop.f32.mrf.mxu2 }
 0x2e5   : > { %v1328_v2 = vpop.f32.mrf.mxu3 }
 0x2e6   : > { %v1382_v4 = vpop.f32.mrf.mxu1 }
 0x2e7   : > { %v1447_v5 = vpop.f32.mrf.mxu0 }
 0x2e8   : > { %v1477_v32 = vadd.f32 %v1447_v5, %v1410_v30 }
 0x2ec   : > { %v1473_v8 = vpop.f32.mrf.mxu2 }
 0x2ed   : > { %v1406_v9 = vpop.f32.mrf.mxu3 }
 0x2ee   : > { %v1460_v11 = vpop.f32.mrf.mxu1  ;;  %v1412_v29 = vadd.f32 %v1406_v9, %v1345_v24 }
 0x2ef   : > { %v1449_v13 = vpop.f32.mrf.mxu0  ;;  %v1478_v22 = vadd.f32 %v1460_v11, %v1411_v18  ;;  %v1870_v18 = vunpack.i.h.bf16 %v1868_v54 }
 0x2f0   : > { %v1479_v34 = vadd.f32 %v1473_v8, %v1412_v29 }
 0x2f1   : > { %v1637_v29 = vsel %vm2426_vm9, %v1869_v58, %v1870_v18 }
 0x2f4   : > { %v1475_v19 = vpop.f32.mrf.mxu2 }
 0x2f5   : > { %v1408_v21 = vpop.f32.mrf.mxu3 }
 0x2f6   : > { %v1462_v23 = vpop.f32.mrf.mxu1 }
 0x2f7   : > { %v1527_v25 = vpop.f32.mrf.mxu0 }
 0x2f8   : > { %v1545_v27 = vadd.f32 %v1527_v25, %v1478_v22 }
 0x2fa   : > { %v1554_v31 = vadd.f32 %v1551_v28, %v1545_v27 }
 0x2fc   : > { %v1803_v33 = vmul.f32 -1.442695, %v1554_v31 }
 0x2fd   : > { %v1514_v35 = vpop.f32.mrf.mxu3 }
 0x2fe   : > { %1884 = vpow2.f32 %v1803_v33  ;;  %v1544_v36 = vadd.f32 %v1514_v35, %v1477_v32  ;;  %v1540_v37 = vpop.f32.mrf.mxu1 }
 0x2ff   : > { %v1546_v38 = vadd.f32 %v1540_v37, %v1479_v34  ;;  %v1529_v39 = vpop.f32.mrf.mxu0 }
 0x300   : > { %v2354_v40 = vadd.f32 %v1551_v28, %v1544_v36 }
 0x301   : > { %v2356_v41 = vadd.f32 %v1551_v28, %v1546_v38 }
 0x302   : > { %v1802_v42 = vmul.f32 -1.442695, %v2354_v40 }
 0x303   : > { %v1804_v43 = vmul.f32 -1.442695, %v2356_v41 }
 0x304   : > { %v1885_v44 = vpop.eup %1884  ;;  %1886 = vpow2.f32 %v1802_v42 }
 0x305   : > { %v1566_v45 = vadd.f32 1.0, %v1885_v44  ;;  %1888 = vpow2.f32 %v1804_v43  ;;  %v1516_v46 = vpop.f32.mrf.mxu3 }
 0x306   : > { %v1542_v47 = vpop.f32.mrf.mxu1 }
 0x307   : > { %1890 = vrcp.f32 %v1566_v45  ;;  %v1594_v57 = vand.u32 2147483648, %v1566_v45  ;;  %v1592_v60 = vand.u32 2147483647, %v1566_v45  ;;  %vm1588_vm1 = vweird.f32 %v1566_v45 }
 0x309   : > { %v1595_v2 = vor.u32 1.1754944e-38, %v1594_v57  ;;  %vm1593_vm10 = vcmp.eq.f32.partialorder %v1592_v60, 8.507059e+37 }
 0x30a   : > { %v1887_v48 = vpop.eup %1886 }
 0x30b   : > { %v1889_v49 = vpop.eup %1888  ;;  %v1565_v50 = vadd.f32 1.0, %v1887_v48 }
 0x30c   : > { %v1567_v51 = vadd.f32 1.0, %v1889_v49 }
 0x30d   : > { %v1891_v52 = vpop.eup %1890  ;;  %1892 = vrcp.f32 %v1565_v50  ;;  %v1577_v8 = vand.u32 2147483647, %v1565_v50  ;;  %v1579_v9 = vand.u32 2147483648, %v1565_v50  ;;  %vm1573_vm2 = vweird.f32 %v1565_v50 }
 0x30e   : > { %v1584_v53 = vmul.f32 %v1891_v52, %v1566_v45  ;;  %1894 = vrcp.f32 %v1567_v51  ;;  %vm1589_vm0 = vweird.f32 %v1891_v52  ;;  %v1609_v13 = vand.u32 2147483648, %v1567_v51 }
 0x30f   : > { %vm1590_vm15 = vmor %vm1588_vm1, %vm1589_vm0  ;;  %v1607_v15 = vand.u32 2147483647, %v1567_v51  ;;  %v1580_v20 = vor.u32 1.1754944e-38, %v1579_v9  ;;  %vm1603_vm4 = vweird.f32 %v1567_v51  ;;  %vm1578_vm5 = vcmp.eq.f32.partialorder %v1577_v8, 8.507059e+37 }
 0x310   : > { %v1585_v56 = vsub.f32 1.0, %v1584_v53  ;;  %v1610_v23 = vor.u32 1.1754944e-38, %v1609_v13 }
 0x311   : > { %vm1608_vm7 = vcmp.eq.f32.partialorder %v1607_v15, 8.507059e+37 }
 0x312   : > { %v1586_v59 = vmul.f32 %v1891_v52, %v1585_v56 }
 0x313   : > { %v1893_v62 = vpop.eup %1892 }
 0x314   : > { %v1895_v63 = vpop.eup %1894  ;;  %v1587_v0 = vadd.f32 %v1891_v52, %v1586_v59  ;;  %v1569_v1 = vmul.f32 %v1893_v62, %v1565_v50  ;;  %vm1574_vm13 = vweird.f32 %v1893_v62 }
 0x315   : > { %v1599_v3 = vmul.f32 %v1895_v63, %v1567_v51  ;;  %vm1604_vm12 = vweird.f32 %v1895_v63  ;;  %vm1575_vm3 = vmor %vm1573_vm2, %vm1574_vm13 }
 0x316   : > { %v1591_v4 = vsel %vm1590_vm15, %v1891_v52, %v1587_v0  ;;  %v1570_v5 = vsub.f32 1.0, %v1569_v1  ;;  %vm1605_vm6 = vmor %vm1603_vm4, %vm1604_vm12 }
 0x317   : > { %v1596_v7 = vsel %vm1593_vm10, %v1595_v2, %v1591_v4  ;;  %v1600_v10 = vsub.f32 1.0, %v1599_v3 }
 0x318   : > { %v1614_v11 = vmul.f32 %v1596_v7, %v1554_v31  ;;  %v1571_v12 = vmul.f32 %v1893_v62, %v1570_v5 }
 0x319   : > { %v1601_v14 = vmul.f32 %v1895_v63, %v1600_v10 }
 0x31a   : > { %v1572_v17 = vadd.f32 %v1893_v62, %v1571_v12  ;;  %v1642_v19 = vadd.f32 %v1636_v6, %v1614_v11 }
 0x31b   : > { %v1602_v21 = vadd.f32 %v1895_v63, %v1601_v14 }
 0x31c   : > { %v1576_v22 = vsel %vm1575_vm3, %v1893_v62, %v1572_v17  ;;  %1645 = vst [vmem:[%s244_s29 + $0x8] sm:$0xff] %v1642_v19 }
 0x31d   : > { %v1581_v24 = vsel %vm1578_vm5, %v1580_v20, %v1576_v22  ;;  %v1606_v25 = vsel %vm1605_vm6, %v1895_v63, %v1602_v21 }
 0x31e   : > { %v1613_v27 = vmul.f32 %v1581_v24, %v2354_v40  ;;  %v1611_v28 = vsel %vm1608_vm7, %v1610_v23, %v1606_v25 }
 0x31f   : > { %v1615_v30 = vmul.f32 %v1611_v28, %v2356_v41 }
 0x320   : > { %v1641_v31 = vadd.f32 %v1635_v26, %v1613_v27 }
 0x321   : > { %v1643_v32 = vadd.f32 %v1637_v29, %v1615_v30 }
 0x322   : > { %1644 = vst [vmem:[%s244_s29] sm:$0xff] %v1641_v31 }
 0x323   : > { %1646 = vst [vmem:[%s244_s29 + $0x10] sm:$0xff] %v1643_v32 }
 0x324   : > { %1923 = shalt.err (!%p1920_p3)
}
 0x325   : > { %1811 = dma.vmem_to_hbm [thread:$0]  (%p2043_p5), %s1662_s9, 384, %s1664_s10, %s1648_s14  }
 0x326 PF: > { %p1817_p4 = scmp.ge.s32.totalorder %s1958_s24, 2  ;;  %s1675_s13 = sand.u32 1, %s1946_s21  }
 0x327   : > { %s1676_s11 = scalar_lea.sflag [#allocation4], %s1675_s13 }
 0x328   : > { %p1814_p7 = pnand %p1817_p4, %p2047_p6 }
 0x32a   : > { %p1815_p8 = pneg %p1814_p7 }
 0x32c   : > { %1941 = dma.done.wait (%p1815_p8), %s1676_s11, 384  }
 0x32d   : > { %1943 = vsyncadd (%p1815_p8), %s1676_s11, 4294966912  ;;  %p16_p9 = scmp.ge.s32.totalorder %s2030_s27, 4   ;;  %s2427_s21 = smov %s1950_s22 }
 0x32e   : > { %s2428_s22 = smov %s1954_s23  ;;  %s2429_s23 = smov %s2041_s30 }
 0x32f   : > { %s2430_s24 = smov %s2030_s27  ;;  %18 = sbr.rel (!%p16_p9) target bundleno = 3 (0x3), region = 95 }
 0x334   :  { %1682 = vsyncpa [#allocation4], 1 }
 0x335   :  { %1684 = vsyncpa [#allocation4 + $0x1], 1 }

</bundles_post_ra>
